<compile_context>
chip_gen: v5e
topology: v5e:2x2
jax: 0.10.0
libtpu: 0.0.40
codegen_flags: <defaults>
</compile_context>

<pallas_src>
import functools
import math

import jax
import jax.numpy as jnp
from jax import lax
from jax.experimental import pallas as pl
from jax.experimental.pallas import tpu as pltpu


def _mha_kernel(x_ref, wq_ref, wk_ref, wv_ref, wo_ref, b_ref, o_ref,
                k_cache, v_cache, ctx_ref, *, n_head, head_dim, tq):
    """One grid step = one (batch element, query tile).

    x_ref   : (1, S, D)  bf16   full sequence for this batch element
    w*_ref  : (D, D)     bf16   pre-transposed (in, out); Wq already carries 1/sqrt(hd)
    b_ref   : (4, D)     f32    [bq*scale; bk; bv; bo]
    o_ref   : (1, tq, D) f32    output rows for this query tile
    k_cache : (S, D)     bf16   VMEM scratch, persists across qi (K projection + bias)
    v_cache : (S, D)     bf16   VMEM scratch, persists across qi (V projection + bias)
    ctx_ref : (tq, D)    bf16   VMEM scratch, per-head contexts in "concat" layout
    """
    qi = pl.program_id(1)

    # --- K/V projections: once per batch element, cached across query tiles. ----------
    @pl.when(qi == 0)
    def _():
        xkv = x_ref[0]                                                     # (S, D) bf16
        k = jnp.dot(xkv, wk_ref[...],
                    preferred_element_type=jnp.float32) + b_ref[1:2, :]
        v = jnp.dot(xkv, wv_ref[...],
                    preferred_element_type=jnp.float32) + b_ref[2:3, :]
        k_cache[...] = k.astype(jnp.bfloat16)
        v_cache[...] = v.astype(jnp.bfloat16)

    # --- Q projection for this tile (queries are a slice of the same x block). --------
    q_start = pl.multiple_of(qi * tq, tq)
    xq = x_ref[0, pl.ds(q_start, tq), :]                                   # (tq, D) bf16
    q = jnp.dot(xq, wq_ref[...],
                preferred_element_type=jnp.float32) + b_ref[0:1, :]        # (tq, D) f32
    q_bf = q.astype(jnp.bfloat16)   # softmax scale already folded into Wq/bq on host

    # Contract last dims of both operands: q @ k.T without an explicit transpose.
    contract_last = (((1,), (1,)), ((), ()))

    for h in range(n_head):                       # static unroll over heads
        lo = h * head_dim
        hi = lo + head_dim
        s = lax.dot_general(q_bf[:, lo:hi], k_cache[:, lo:hi], contract_last,
                            preferred_element_type=jnp.float32)            # (tq, S) f32
        m = jnp.max(s, axis=-1, keepdims=True)
        p = jnp.exp(s - m)
        denom = jnp.sum(p, axis=-1, keepdims=True)
        attn = p * pl.reciprocal(denom, approx=True)                       # EUP vrcp
        # dropout(attn) -> identity (inference).
        ctx = jnp.dot(attn.astype(jnp.bfloat16), v_cache[:, lo:hi],
                      preferred_element_type=jnp.float32)                  # (tq, hd) f32
        # Stash this head's context at its static lane offset -> "concat" layout.
        ctx_ref[:, lo:hi] = ctx.astype(jnp.bfloat16)

    # --- Single full-depth output projection (replaces n_head K=head_dim matmuls). ----
    out = jnp.dot(ctx_ref[...], wo_ref[...],
                  preferred_element_type=jnp.float32) + b_ref[3:4, :]
    o_ref[0] = out.astype(o_ref.dtype)


def _device_kind():
    try:
        return jax.devices()[0].device_kind.lower()
    except Exception:
        return ""


def _pick_tq(S):
    """tq=256 matches the 256-deep MXU M dim on v6e/v7x; v5e's MXU is 128-deep."""
    kind = _device_kind()
    is_v5e = ("v5 lite" in kind) or ("v5e" in kind) or ("v5litepod" in kind)
    if (not is_v5e) and S % 256 == 0:
        return 256
    if S % 128 == 0:
        return 128
    return S


def _vmem_limit_bytes():
    """~75% of physical VMEM (v7x has only 64 MiB/TC; never request all of it)."""
    try:
        cap = int(pltpu.get_tpu_info().vmem_capacity_bytes)
    except Exception:
        cap = 0
    if cap <= 0:
        return 48 * 1024 * 1024
    return min((cap * 3) // 4, 96 * 1024 * 1024)


def _const_spec(shape, buffered):
    """BlockSpec for a grid-invariant operand (weights / biases): fetched once."""
    index_map = lambda b, qi: (0,) * len(shape)
    if buffered:
        try:
            return pl.BlockSpec(shape, index_map, pipeline_mode=pl.Buffered(1))
        except (AttributeError, TypeError):
            pass
    return pl.BlockSpec(shape, index_map)


def mha_forward(x, params, *, n_head):
    """x: (B, S, D) float32; params follow the PyTorch Linear convention (W: (out, in))."""
    B, S, D = x.shape
    assert D % n_head == 0
    head_dim = D // n_head
    scale = 1.0 / math.sqrt(head_dim)

    # Host-side prep (once): pre-transpose weights to (in, out), fold the softmax scale
    # into Wq/bq, cast weights + activations to bf16 (MXU-native), keep biases in f32.
    wq_t = jnp.asarray(params["wq"].T * scale, dtype=jnp.bfloat16)
    wk_t = jnp.asarray(params["wk"].T, dtype=jnp.bfloat16)
    wv_t = jnp.asarray(params["wv"].T, dtype=jnp.bfloat16)
    wo_t = jnp.asarray(params["wo"].T, dtype=jnp.bfloat16)
    biases = jnp.stack(
        [params["bq"] * scale, params["bk"], params["bv"], params["bo"]], axis=0
    ).astype(jnp.float32)                                                  # (4, D)
    x_bf = x.astype(jnp.bfloat16)

    tq = _pick_tq(S)
    num_q_tiles = S // tq

    kernel = functools.partial(_mha_kernel, n_head=n_head, head_dim=head_dim, tq=tq)

    # Advisory cost estimate: K/V + Wo counted once per batch element (cached across
    # query tiles), x DMA'd once per batch element in bf16.
    flops = B * (8 * S * D * D + 4 * S * S * D)
    transcendentals = B * n_head * S * S
    bytes_accessed = (B * S * D * 2        # x (bf16), read once per batch element
                      + 4 * D * D * 2      # bf16 weights (fetched once)
                      + 4 * D * 4          # biases
                      + B * S * D * 4)     # f32 output

    def run(buffered_weights):
        grid_spec = pltpu.PrefetchScalarGridSpec(
            num_scalar_prefetch=0,
            grid=(B, num_q_tiles),
            in_specs=[
                # x[b] (full sequence): query rows are sliced from this block in-kernel,
                # so x is only DMA'd once per batch element.
                pl.BlockSpec((1, S, D), lambda b, qi: (b, 0, 0)),
                _const_spec((D, D), buffered_weights),   # Wq.T * scale
                _const_spec((D, D), buffered_weights),   # Wk.T
                _const_spec((D, D), buffered_weights),   # Wv.T
                _const_spec((D, D), buffered_weights),   # Wo.T
                _const_spec((4, D), buffered_weights),   # [bq*scale; bk; bv; bo]
            ],
            out_specs=pl.BlockSpec((1, tq, D), lambda b, qi: (b, qi, 0)),
            scratch_shapes=[
                pltpu.VMEM((S, D), jnp.bfloat16),    # K cache (persists across qi)
                pltpu.VMEM((S, D), jnp.bfloat16),    # V cache (persists across qi)
                pltpu.VMEM((tq, D), jnp.bfloat16),   # per-tile concat(ctx_h) layout
            ],
        )
        return pl.pallas_call(
            kernel,
            out_shape=jax.ShapeDtypeStruct((B, S, D), x.dtype),
            grid_spec=grid_spec,
            compiler_params=pltpu.CompilerParams(
                # batch axis shards across v7x's 2 TCs; the qi axis must be sequential
                # so the K/V scratch computed at qi == 0 is reused by later tiles.
                dimension_semantics=("parallel", "arbitrary"),
                vmem_limit_bytes=_vmem_limit_bytes(),
            ),
            cost_estimate=pl.CostEstimate(
                flops=flops,
                transcendentals=transcendentals,
                bytes_accessed=bytes_accessed,
            ),
        )(x_bf, wq_t, wk_t, wv_t, wo_t, biases)

    try:
        return run(True)
    except Exception:
        # Fallback if single-buffered (pl.Buffered(1)) weight specs are rejected by this
        # Pallas/Mosaic version; only costs one extra pipeline buffer for the weights.
        return run(False)


def _init_linear(key, d_in, d_out):
    # Deterministic init mimicking nn.Linear default: U(-1/sqrt(d_in), 1/sqrt(d_in)).
    kw, kb = jax.random.split(key)
    bound = 1.0 / math.sqrt(d_in)
    w = jax.random.uniform(kw, (d_out, d_in), jnp.float32, -bound, bound)
    b = jax.random.uniform(kb, (d_out,), jnp.float32, -bound, bound)
    return w, b


def _make_params(key, D):
    kq, kk, kv, ko = jax.random.split(key, 4)
    wq, bq = _init_linear(kq, D, D)
    wk, bk = _init_linear(kk, D, D)
    wv, bv = _init_linear(kv, D, D)
    wo, bo = _init_linear(ko, D, D)
    return dict(wq=wq, bq=bq, wk=wk, bk=bk, wv=wv, bv=bv, wo=wo, bo=bo)


def _reference(x, params, n_head):
    """Pure-f32 reference matching the PyTorch module."""
    B, S, D = x.shape
    hd = D // n_head
    q = x @ params["wq"].T + params["bq"]
    k = x @ params["wk"].T + params["bk"]
    v = x @ params["wv"].T + params["bv"]
    q = q.reshape(B, S, n_head, hd).transpose(0, 2, 1, 3)
    k = k.reshape(B, S, n_head, hd).transpose(0, 2, 1, 3)
    v = v.reshape(B, S, n_head, hd).transpose(0, 2, 1, 3)
    scores = jnp.einsum("bhqd,bhkd->bhqk", q, k) / math.sqrt(hd)
    attn = jax.nn.softmax(scores, axis=-1)
    out = jnp.einsum("bhqk,bhkd->bhqd", attn, v)
    out = out.transpose(0, 2, 1, 3).reshape(B, S, D)
    return out @ params["wo"].T + params["bo"]


if __name__ == "__main__":
    key = jax.random.PRNGKey(0)
    k_small, k_big = jax.random.split(key)

    # --- Small shape consistent with the module (single query tile path). -------------
    B, S, D, n_head = 2, 8, 32, 4
    kx, kp = jax.random.split(k_small)
    x = jax.random.normal(kx, (B, S, D), jnp.float32)
    params = _make_params(kp, D)
    out = jax.block_until_ready(mha_forward(x, params, n_head=n_head))
    ref = _reference(x, params, n_head)
    assert out.shape == (B, S, D)
    # bf16 MXU inputs loosen accuracy vs the pure-f32 reference; still catches any
    # structural bug (wrong transpose / scale / head layout), which would be O(1).
    assert jnp.allclose(out, ref, atol=3e-2, rtol=3e-2), "small-shape mismatch vs. reference"

    # --- Larger shape exercising the multi-query-tile path (K/V scratch reused across
    # qi, (8,128)-aligned tiles, lane-offset ctx stores). Loose tolerance: bf16 x and
    # weights; structural bugs (stale K/V cache, wrong tile offset) give O(1) errors. ---
    B2, S2, D2, n_head2 = 2, 384, 128, 2
    kx2, kp2 = jax.random.split(k_big)
    x2 = jax.random.normal(kx2, (B2, S2, D2), jnp.float32)
    params2 = _make_params(kp2, D2)
    out2 = jax.block_until_ready(mha_forward(x2, params2, n_head=n_head2))
    ref2 = _reference(x2, params2, n_head2)
    max_err = float(jnp.max(jnp.abs(out2 - ref2)))
    assert jnp.allclose(out2, ref2, atol=7.5e-2, rtol=7.5e-2), (
        f"multi-tile mismatch vs. reference (max abs err {max_err})")

    print("KERNEL_OK")
</pallas_src>

<mosaic_0001>
module attributes {stable_mosaic.version = 11 : i64} {
  func.func @_mha_kernel(%arg0: i32, %arg1: i32, %arg2: memref<1x8x32xbf16, #tpu.memory_space<vmem>>, %arg3: memref<32x32xbf16, #tpu.memory_space<vmem>>, %arg4: memref<32x32xbf16, #tpu.memory_space<vmem>>, %arg5: memref<32x32xbf16, #tpu.memory_space<vmem>>, %arg6: memref<32x32xbf16, #tpu.memory_space<vmem>>, %arg7: memref<4x32xf32, #tpu.memory_space<vmem>>, %arg8: memref<1x8x32xf32, #tpu.memory_space<vmem>>, %arg9: memref<8x32xbf16, #tpu.memory_space<vmem>>, %arg10: memref<8x32xbf16, #tpu.memory_space<vmem>>, %arg11: memref<8x32xbf16, #tpu.memory_space<vmem>>) attributes {dimension_semantics = [#tpu.dimension_semantics<parallel>, #tpu.dimension_semantics<arbitrary>], iteration_bounds = array<i64: 2, 1>, scalar_prefetch = 0 : i64, scratch_operands = 3 : i64, tpu.core_type = #tpu.core_type<tc>, window_params = [{transform_indices = @transform_0, window_bounds = array<i64: 1, 8, 32>}, {pipeline_mode = #tpu.pipeline_mode<synchronous>, transform_indices = @transform_1, window_bounds = array<i64: 32, 32>}, {pipeline_mode = #tpu.pipeline_mode<synchronous>, transform_indices = @transform_2, window_bounds = array<i64: 32, 32>}, {pipeline_mode = #tpu.pipeline_mode<synchronous>, transform_indices = @transform_3, window_bounds = array<i64: 32, 32>}, {pipeline_mode = #tpu.pipeline_mode<synchronous>, transform_indices = @transform_4, window_bounds = array<i64: 32, 32>}, {pipeline_mode = #tpu.pipeline_mode<synchronous>, transform_indices = @transform_5, window_bounds = array<i64: 4, 32>}, {transform_indices = @transform_6, window_bounds = array<i64: 1, 8, 32>}]} {
    %c0_i32 = arith.constant 0 : i32
    %0 = arith.cmpi eq, %arg1, %c0_i32 : i32
    %1 = arith.extui %0 : i1 to i32
    %c0_i32_0 = arith.constant 0 : i32
    %2 = arith.cmpi ne, %1, %c0_i32_0 : i32
    scf.if %2 {
      %c0_52 = arith.constant 0 : index
      %c0_53 = arith.constant 0 : index
      %c0_54 = arith.constant 0 : index
      %95 = vector.load %arg2[%c0_52, %c0_53, %c0_54] : memref<1x8x32xbf16, #tpu.memory_space<vmem>>, vector<1x8x32xbf16>
      %96 = vector.shape_cast %95 : vector<1x8x32xbf16> to vector<8x32xbf16>
      %c0_55 = arith.constant 0 : index
      %c0_56 = arith.constant 0 : index
      %97 = vector.load %arg4[%c0_55, %c0_56] : memref<32x32xbf16, #tpu.memory_space<vmem>>, vector<32x32xbf16>
      %cst_57 = arith.constant dense<0.000000e+00> : vector<8x32xf32>
      %98 = tpu.matmul %96, %97, %cst_57 {dimension_numbers = #tpu.dot_dimension_numbers<[1], [0], [0], [1], [0, 0, 1, 1], [], []>} : vector<8x32xbf16>, vector<32x32xbf16>, vector<8x32xf32> -> vector<8x32xf32>
      %c1 = arith.constant 1 : index
      %c0_58 = arith.constant 0 : index
      %99 = vector.load %arg7[%c1, %c0_58] : memref<4x32xf32, #tpu.memory_space<vmem>>, vector<1x32xf32>
      %100 = vector.broadcast %99 : vector<1x32xf32> to vector<8x32xf32>
      %101 = arith.addf %98, %100 : vector<8x32xf32>
      %c0_59 = arith.constant 0 : index
      %c0_60 = arith.constant 0 : index
      %102 = vector.load %arg5[%c0_59, %c0_60] : memref<32x32xbf16, #tpu.memory_space<vmem>>, vector<32x32xbf16>
      %cst_61 = arith.constant dense<0.000000e+00> : vector<8x32xf32>
      %103 = tpu.matmul %96, %102, %cst_61 {dimension_numbers = #tpu.dot_dimension_numbers<[1], [0], [0], [1], [0, 0, 1, 1], [], []>} : vector<8x32xbf16>, vector<32x32xbf16>, vector<8x32xf32> -> vector<8x32xf32>
      %c2 = arith.constant 2 : index
      %c0_62 = arith.constant 0 : index
      %104 = vector.load %arg7[%c2, %c0_62] : memref<4x32xf32, #tpu.memory_space<vmem>>, vector<1x32xf32>
      %105 = vector.broadcast %104 : vector<1x32xf32> to vector<8x32xf32>
      %106 = arith.addf %103, %105 : vector<8x32xf32>
      %107 = arith.truncf %101 : vector<8x32xf32> to vector<8x32xbf16>
      %c0_63 = arith.constant 0 : index
      %c0_64 = arith.constant 0 : index
      %108 = vector.load %arg9[%c0_63, %c0_64] : memref<8x32xbf16, #tpu.memory_space<vmem>>, vector<8x32xbf16>
      tpu.vector_store %arg9[%c0_63, %c0_64], %107 {strides = array<i32>} : memref<8x32xbf16, #tpu.memory_space<vmem>>, vector<8x32xbf16>,
      %109 = arith.truncf %106 : vector<8x32xf32> to vector<8x32xbf16>
      %c0_65 = arith.constant 0 : index
      %c0_66 = arith.constant 0 : index
      %110 = vector.load %arg10[%c0_65, %c0_66] : memref<8x32xbf16, #tpu.memory_space<vmem>>, vector<8x32xbf16>
      tpu.vector_store %arg10[%c0_65, %c0_66], %109 {strides = array<i32>} : memref<8x32xbf16, #tpu.memory_space<vmem>>, vector<8x32xbf16>,
    } else {
    }
    %c8_i32 = arith.constant 8 : i32
    %3 = arith.muli %arg1, %c8_i32 : i32
    %4 = tpu.assume_multiple %3, 8 : i32
    %c0 = arith.constant 0 : index
    %5 = arith.index_cast %4 : i32 to index
    %c0_1 = arith.constant 0 : index
    %6 = vector.load %arg2[%c0, %5, %c0_1] : memref<1x8x32xbf16, #tpu.memory_space<vmem>>, vector<1x8x32xbf16>
    %7 = vector.shape_cast %6 : vector<1x8x32xbf16> to vector<8x32xbf16>
    %c0_2 = arith.constant 0 : index
    %c0_3 = arith.constant 0 : index
    %8 = vector.load %arg3[%c0_2, %c0_3] : memref<32x32xbf16, #tpu.memory_space<vmem>>, vector<32x32xbf16>
    %cst = arith.constant dense<0.000000e+00> : vector<8x32xf32>
    %9 = tpu.matmul %7, %8, %cst {dimension_numbers = #tpu.dot_dimension_numbers<[1], [0], [0], [1], [0, 0, 1, 1], [], []>} : vector<8x32xbf16>, vector<32x32xbf16>, vector<8x32xf32> -> vector<8x32xf32>
    %c0_4 = arith.constant 0 : index
    %c0_5 = arith.constant 0 : index
    %10 = vector.load %arg7[%c0_4, %c0_5] : memref<4x32xf32, #tpu.memory_space<vmem>>, vector<1x32xf32>
    %11 = vector.broadcast %10 : vector<1x32xf32> to vector<8x32xf32>
    %12 = arith.addf %9, %11 : vector<8x32xf32>
    %13 = arith.truncf %12 : vector<8x32xf32> to vector<8x32xbf16>
    %14 = vector.extract_strided_slice %13 {offsets = [0, 0], sizes = [8, 8], strides = [1, 1]} : vector<8x32xbf16> to vector<8x8xbf16>
    %c0_6 = arith.constant 0 : index
    %c0_7 = arith.constant 0 : index
    %15 = vector.load %arg9[%c0_6, %c0_7] : memref<8x32xbf16, #tpu.memory_space<vmem>>, vector<8x8xbf16>
    %cst_8 = arith.constant dense<0.000000e+00> : vector<8x8xf32>
    %16 = tpu.matmul %14, %15, %cst_8 {dimension_numbers = #tpu.dot_dimension_numbers<[1], [1], [0], [0], [0, 0, 1, 0], [], []>} : vector<8x8xbf16>, vector<8x8xbf16>, vector<8x8xf32> -> vector<8x8xf32>
    %cst_9 = arith.constant dense<0xFF800000> : vector<8xf32>
    %17 = vector.multi_reduction <maximumf>, %16, %cst_9 [1] : vector<8x8xf32> to vector<8xf32>
    %18 = vector.shape_cast %17 : vector<8xf32> to vector<8x1xf32>
    %19 = vector.broadcast %18 : vector<8x1xf32> to vector<8x8xf32>
    %20 = arith.subf %16, %19 : vector<8x8xf32>
    %21 = math.exp %20 : vector<8x8xf32>
    %cst_10 = arith.constant dense<0.000000e+00> : vector<8xf32>
    %22 = vector.multi_reduction <add>, %21, %cst_10 [1] : vector<8x8xf32> to vector<8xf32>
    %23 = vector.shape_cast %22 : vector<8xf32> to vector<8x1xf32>
    %24 = tpu.reciprocal %23 {approx = true} : vector<8x1xf32> -> vector<8x1xf32>
    %25 = vector.broadcast %24 : vector<8x1xf32> to vector<8x8xf32>
    %26 = arith.mulf %21, %25 : vector<8x8xf32>
    %27 = arith.truncf %26 : vector<8x8xf32> to vector<8x8xbf16>
    %c0_11 = arith.constant 0 : index
    %c0_12 = arith.constant 0 : index
    %28 = vector.load %arg10[%c0_11, %c0_12] : memref<8x32xbf16, #tpu.memory_space<vmem>>, vector<8x8xbf16>
    %cst_13 = arith.constant dense<0.000000e+00> : vector<8x8xf32>
    %29 = tpu.matmul %27, %28, %cst_13 {dimension_numbers = #tpu.dot_dimension_numbers<[1], [0], [0], [1], [0, 0, 1, 1], [], []>} : vector<8x8xbf16>, vector<8x8xbf16>, vector<8x8xf32> -> vector<8x8xf32>
    %30 = arith.truncf %29 : vector<8x8xf32> to vector<8x8xbf16>
    %c0_14 = arith.constant 0 : index
    %c0_15 = arith.constant 0 : index
    %31 = vector.load %arg11[%c0_14, %c0_15] : memref<8x32xbf16, #tpu.memory_space<vmem>>, vector<8x8xbf16>
    tpu.vector_store %arg11[%c0_14, %c0_15], %30 {strides = array<i32>} : memref<8x32xbf16, #tpu.memory_space<vmem>>, vector<8x8xbf16>,
    %32 = vector.extract_strided_slice %13 {offsets = [0, 8], sizes = [8, 8], strides = [1, 1]} : vector<8x32xbf16> to vector<8x8xbf16>
    %c0_16 = arith.constant 0 : index
    %c8 = arith.constant 8 : index
    %33 = vector.load %arg9[%c0_16, %c8] : memref<8x32xbf16, #tpu.memory_space<vmem>>, vector<8x8xbf16>
    %cst_17 = arith.constant dense<0.000000e+00> : vector<8x8xf32>
    %34 = tpu.matmul %32, %33, %cst_17 {dimension_numbers = #tpu.dot_dimension_numbers<[1], [1], [0], [0], [0, 0, 1, 0], [], []>} : vector<8x8xbf16>, vector<8x8xbf16>, vector<8x8xf32> -> vector<8x8xf32>
    %cst_18 = arith.constant dense<0xFF800000> : vector<8xf32>
    %35 = vector.multi_reduction <maximumf>, %34, %cst_18 [1] : vector<8x8xf32> to vector<8xf32>
    %36 = vector.shape_cast %35 : vector<8xf32> to vector<8x1xf32>
    %37 = vector.broadcast %36 : vector<8x1xf32> to vector<8x8xf32>
    %38 = arith.subf %34, %37 : vector<8x8xf32>
    %39 = math.exp %38 : vector<8x8xf32>
    %cst_19 = arith.constant dense<0.000000e+00> : vector<8xf32>
    %40 = vector.multi_reduction <add>, %39, %cst_19 [1] : vector<8x8xf32> to vector<8xf32>
    %41 = vector.shape_cast %40 : vector<8xf32> to vector<8x1xf32>
    %42 = tpu.reciprocal %41 {approx = true} : vector<8x1xf32> -> vector<8x1xf32>
    %43 = vector.broadcast %42 : vector<8x1xf32> to vector<8x8xf32>
    %44 = arith.mulf %39, %43 : vector<8x8xf32>
    %45 = arith.truncf %44 : vector<8x8xf32> to vector<8x8xbf16>
    %c0_20 = arith.constant 0 : index
    %c8_21 = arith.constant 8 : index
    %46 = vector.load %arg10[%c0_20, %c8_21] : memref<8x32xbf16, #tpu.memory_space<vmem>>, vector<8x8xbf16>
    %cst_22 = arith.constant dense<0.000000e+00> : vector<8x8xf32>
    %47 = tpu.matmul %45, %46, %cst_22 {dimension_numbers = #tpu.dot_dimension_numbers<[1], [0], [0], [1], [0, 0, 1, 1], [], []>} : vector<8x8xbf16>, vector<8x8xbf16>, vector<8x8xf32> -> vector<8x8xf32>
    %48 = arith.truncf %47 : vector<8x8xf32> to vector<8x8xbf16>
    %c0_23 = arith.constant 0 : index
    %c8_24 = arith.constant 8 : index
    %49 = vector.load %arg11[%c0_23, %c8_24] : memref<8x32xbf16, #tpu.memory_space<vmem>>, vector<8x8xbf16>
    tpu.vector_store %arg11[%c0_23, %c8_24], %48 {strides = array<i32>} : memref<8x32xbf16, #tpu.memory_space<vmem>>, vector<8x8xbf16>,
    %50 = vector.extract_strided_slice %13 {offsets = [0, 16], sizes = [8, 8], strides = [1, 1]} : vector<8x32xbf16> to vector<8x8xbf16>
    %c0_25 = arith.constant 0 : index
    %c16 = arith.constant 16 : index
    %51 = vector.load %arg9[%c0_25, %c16] : memref<8x32xbf16, #tpu.memory_space<vmem>>, vector<8x8xbf16>
    %cst_26 = arith.constant dense<0.000000e+00> : vector<8x8xf32>
    %52 = tpu.matmul %50, %51, %cst_26 {dimension_numbers = #tpu.dot_dimension_numbers<[1], [1], [0], [0], [0, 0, 1, 0], [], []>} : vector<8x8xbf16>, vector<8x8xbf16>, vector<8x8xf32> -> vector<8x8xf32>
    %cst_27 = arith.constant dense<0xFF800000> : vector<8xf32>
    %53 = vector.multi_reduction <maximumf>, %52, %cst_27 [1] : vector<8x8xf32> to vector<8xf32>
    %54 = vector.shape_cast %53 : vector<8xf32> to vector<8x1xf32>
    %55 = vector.broadcast %54 : vector<8x1xf32> to vector<8x8xf32>
    %56 = arith.subf %52, %55 : vector<8x8xf32>
    %57 = math.exp %56 : vector<8x8xf32>
    %cst_28 = arith.constant dense<0.000000e+00> : vector<8xf32>
    %58 = vector.multi_reduction <add>, %57, %cst_28 [1] : vector<8x8xf32> to vector<8xf32>
    %59 = vector.shape_cast %58 : vector<8xf32> to vector<8x1xf32>
    %60 = tpu.reciprocal %59 {approx = true} : vector<8x1xf32> -> vector<8x1xf32>
    %61 = vector.broadcast %60 : vector<8x1xf32> to vector<8x8xf32>
    %62 = arith.mulf %57, %61 : vector<8x8xf32>
    %63 = arith.truncf %62 : vector<8x8xf32> to vector<8x8xbf16>
    %c0_29 = arith.constant 0 : index
    %c16_30 = arith.constant 16 : index
    %64 = vector.load %arg10[%c0_29, %c16_30] : memref<8x32xbf16, #tpu.memory_space<vmem>>, vector<8x8xbf16>
    %cst_31 = arith.constant dense<0.000000e+00> : vector<8x8xf32>
    %65 = tpu.matmul %63, %64, %cst_31 {dimension_numbers = #tpu.dot_dimension_numbers<[1], [0], [0], [1], [0, 0, 1, 1], [], []>} : vector<8x8xbf16>, vector<8x8xbf16>, vector<8x8xf32> -> vector<8x8xf32>
    %66 = arith.truncf %65 : vector<8x8xf32> to vector<8x8xbf16>
    %c0_32 = arith.constant 0 : index
    %c16_33 = arith.constant 16 : index
    %67 = vector.load %arg11[%c0_32, %c16_33] : memref<8x32xbf16, #tpu.memory_space<vmem>>, vector<8x8xbf16>
    tpu.vector_store %arg11[%c0_32, %c16_33], %66 {strides = array<i32>} : memref<8x32xbf16, #tpu.memory_space<vmem>>, vector<8x8xbf16>,
    %68 = vector.extract_strided_slice %13 {offsets = [0, 24], sizes = [8, 8], strides = [1, 1]} : vector<8x32xbf16> to vector<8x8xbf16>
    %c0_34 = arith.constant 0 : index
    %c24 = arith.constant 24 : index
    %69 = vector.load %arg9[%c0_34, %c24] : memref<8x32xbf16, #tpu.memory_space<vmem>>, vector<8x8xbf16>
    %cst_35 = arith.constant dense<0.000000e+00> : vector<8x8xf32>
    %70 = tpu.matmul %68, %69, %cst_35 {dimension_numbers = #tpu.dot_dimension_numbers<[1], [1], [0], [0], [0, 0, 1, 0], [], []>} : vector<8x8xbf16>, vector<8x8xbf16>, vector<8x8xf32> -> vector<8x8xf32>
    %cst_36 = arith.constant dense<0xFF800000> : vector<8xf32>
    %71 = vector.multi_reduction <maximumf>, %70, %cst_36 [1] : vector<8x8xf32> to vector<8xf32>
    %72 = vector.shape_cast %71 : vector<8xf32> to vector<8x1xf32>
    %73 = vector.broadcast %72 : vector<8x1xf32> to vector<8x8xf32>
    %74 = arith.subf %70, %73 : vector<8x8xf32>
    %75 = math.exp %74 : vector<8x8xf32>
    %cst_37 = arith.constant dense<0.000000e+00> : vector<8xf32>
    %76 = vector.multi_reduction <add>, %75, %cst_37 [1] : vector<8x8xf32> to vector<8xf32>
    %77 = vector.shape_cast %76 : vector<8xf32> to vector<8x1xf32>
    %78 = tpu.reciprocal %77 {approx = true} : vector<8x1xf32> -> vector<8x1xf32>
    %79 = vector.broadcast %78 : vector<8x1xf32> to vector<8x8xf32>
    %80 = arith.mulf %75, %79 : vector<8x8xf32>
    %81 = arith.truncf %80 : vector<8x8xf32> to vector<8x8xbf16>
    %c0_38 = arith.constant 0 : index
    %c24_39 = arith.constant 24 : index
    %82 = vector.load %arg10[%c0_38, %c24_39] : memref<8x32xbf16, #tpu.memory_space<vmem>>, vector<8x8xbf16>
    %cst_40 = arith.constant dense<0.000000e+00> : vector<8x8xf32>
    %83 = tpu.matmul %81, %82, %cst_40 {dimension_numbers = #tpu.dot_dimension_numbers<[1], [0], [0], [1], [0, 0, 1, 1], [], []>} : vector<8x8xbf16>, vector<8x8xbf16>, vector<8x8xf32> -> vector<8x8xf32>
    %84 = arith.truncf %83 : vector<8x8xf32> to vector<8x8xbf16>
    %c0_41 = arith.constant 0 : index
    %c24_42 = arith.constant 24 : index
    %85 = vector.load %arg11[%c0_41, %c24_42] : memref<8x32xbf16, #tpu.memory_space<vmem>>, vector<8x8xbf16>
    tpu.vector_store %arg11[%c0_41, %c24_42], %84 {strides = array<i32>} : memref<8x32xbf16, #tpu.memory_space<vmem>>, vector<8x8xbf16>,
    %c0_43 = arith.constant 0 : index
    %c0_44 = arith.constant 0 : index
    %86 = vector.load %arg11[%c0_43, %c0_44] : memref<8x32xbf16, #tpu.memory_space<vmem>>, vector<8x32xbf16>
    %c0_45 = arith.constant 0 : index
    %c0_46 = arith.constant 0 : index
    %87 = vector.load %arg6[%c0_45, %c0_46] : memref<32x32xbf16, #tpu.memory_space<vmem>>, vector<32x32xbf16>
    %cst_47 = arith.constant dense<0.000000e+00> : vector<8x32xf32>
    %88 = tpu.matmul %86, %87, %cst_47 {dimension_numbers = #tpu.dot_dimension_numbers<[1], [0], [0], [1], [0, 0, 1, 1], [], []>} : vector<8x32xbf16>, vector<32x32xbf16>, vector<8x32xf32> -> vector<8x32xf32>
    %c3 = arith.constant 3 : index
    %c0_48 = arith.constant 0 : index
    %89 = vector.load %arg7[%c3, %c0_48] : memref<4x32xf32, #tpu.memory_space<vmem>>, vector<1x32xf32>
    %90 = vector.broadcast %89 : vector<1x32xf32> to vector<8x32xf32>
    %91 = arith.addf %88, %90 : vector<8x32xf32>
    %c0_49 = arith.constant 0 : index
    %c0_50 = arith.constant 0 : index
    %c0_51 = arith.constant 0 : index
    %92 = vector.load %arg8[%c0_49, %c0_50, %c0_51] : memref<1x8x32xf32, #tpu.memory_space<vmem>>, vector<1x8x32xf32>
    %93 = vector.shape_cast %92 : vector<1x8x32xf32> to vector<8x32xf32>
    %94 = vector.shape_cast %91 : vector<8x32xf32> to vector<1x8x32xf32>
    tpu.vector_store %arg8[%c0_49, %c0_50, %c0_51], %94 {strides = array<i32>} : memref<1x8x32xf32, #tpu.memory_space<vmem>>, vector<1x8x32xf32>,
    return
  }
  func.func @transform_0(%arg0: i32, %arg1: i32) -> (i32, i32, i32) {
    %c0_i32 = arith.constant 0 : i32
    %c0_i32_0 = arith.constant 0 : i32
    %c0_i32_1 = arith.constant 0 : i32
    return %arg0, %c0_i32, %c0_i32_0 : i32, i32, i32
  }
  func.func @transform_1(%arg0: i32, %arg1: i32) -> (i32, i32) {
    %c0_i32 = arith.constant 0 : i32
    %c0_i32_0 = arith.constant 0 : i32
    %c0_i32_1 = arith.constant 0 : i32
    return %c0_i32, %c0_i32_0 : i32, i32
  }
  func.func @transform_2(%arg0: i32, %arg1: i32) -> (i32, i32) {
    %c0_i32 = arith.constant 0 : i32
    %c0_i32_0 = arith.constant 0 : i32
    %c0_i32_1 = arith.constant 0 : i32
    return %c0_i32, %c0_i32_0 : i32, i32
  }
  func.func @transform_3(%arg0: i32, %arg1: i32) -> (i32, i32) {
    %c0_i32 = arith.constant 0 : i32
    %c0_i32_0 = arith.constant 0 : i32
    %c0_i32_1 = arith.constant 0 : i32
    return %c0_i32, %c0_i32_0 : i32, i32
  }
  func.func @transform_4(%arg0: i32, %arg1: i32) -> (i32, i32) {
    %c0_i32 = arith.constant 0 : i32
    %c0_i32_0 = arith.constant 0 : i32
    %c0_i32_1 = arith.constant 0 : i32
    return %c0_i32, %c0_i32_0 : i32, i32
  }
  func.func @transform_5(%arg0: i32, %arg1: i32) -> (i32, i32) {
    %c0_i32 = arith.constant 0 : i32
    %c0_i32_0 = arith.constant 0 : i32
    %c0_i32_1 = arith.constant 0 : i32
    return %c0_i32, %c0_i32_0 : i32, i32
  }
  func.func @transform_6(%arg0: i32, %arg1: i32) -> (i32, i32, i32) {
    %c0_i32 = arith.constant 0 : i32
    %c0_i32_0 = arith.constant 0 : i32
    return %arg0, %arg1, %c0_i32 : i32, i32, i32
  }
}

module attributes {stable_mosaic.version = 11 : i64} {
  func.func @_mha_kernel(%arg0: i32, %arg1: i32, %arg2: memref<1x8x32xbf16, #tpu.memory_space<vmem>>, %arg3: memref<32x32xbf16, #tpu.memory_space<vmem>>, %arg4: memref<32x32xbf16, #tpu.memory_space<vmem>>, %arg5: memref<32x32xbf16, #tpu.memory_space<vmem>>, %arg6: memref<32x32xbf16, #tpu.memory_space<vmem>>, %arg7: memref<4x32xf32, #tpu.memory_space<vmem>>, %arg8: memref<1x8x32xf32, #tpu.memory_space<vmem>>, %arg9: memref<8x32xbf16, #tpu.memory_space<vmem>>, %arg10: memref<8x32xbf16, #tpu.memory_space<vmem>>, %arg11: memref<8x32xbf16, #tpu.memory_space<vmem>>) attributes {dimension_semantics = [#tpu.dimension_semantics<parallel>, #tpu.dimension_semantics<arbitrary>], iteration_bounds = array<i64: 2, 1>, scalar_prefetch = 0 : i64, scratch_operands = 3 : i64, tpu.core_type = #tpu.core_type<tc>, window_params = [{transform_indices = @transform_0, window_bounds = array<i64: 1, 8, 32>}, {pipeline_mode = #tpu.pipeline_mode<synchronous>, transform_indices = @transform_1, window_bounds = array<i64: 32, 32>}, {pipeline_mode = #tpu.pipeline_mode<synchronous>, transform_indices = @transform_2, window_bounds = array<i64: 32, 32>}, {pipeline_mode = #tpu.pipeline_mode<synchronous>, transform_indices = @transform_3, window_bounds = array<i64: 32, 32>}, {pipeline_mode = #tpu.pipeline_mode<synchronous>, transform_indices = @transform_4, window_bounds = array<i64: 32, 32>}, {pipeline_mode = #tpu.pipeline_mode<synchronous>, transform_indices = @transform_5, window_bounds = array<i64: 4, 32>}, {transform_indices = @transform_6, window_bounds = array<i64: 1, 8, 32>}]} {
    %c0_i32 = arith.constant 0 : i32
    %0 = arith.cmpi eq, %arg1, %c0_i32 : i32
    %1 = arith.extui %0 : i1 to i32
    %c0_i32_0 = arith.constant 0 : i32
    %2 = arith.cmpi ne, %1, %c0_i32_0 : i32
    scf.if %2 {
      %c0_52 = arith.constant 0 : index
      %c0_53 = arith.constant 0 : index
      %c0_54 = arith.constant 0 : index
      %95 = vector.load %arg2[%c0_52, %c0_53, %c0_54] : memref<1x8x32xbf16, #tpu.memory_space<vmem>>, vector<1x8x32xbf16>
      %96 = vector.shape_cast %95 : vector<1x8x32xbf16> to vector<8x32xbf16>
      %c0_55 = arith.constant 0 : index
      %c0_56 = arith.constant 0 : index
      %97 = vector.load %arg4[%c0_55, %c0_56] : memref<32x32xbf16, #tpu.memory_space<vmem>>, vector<32x32xbf16>
      %cst_57 = arith.constant dense<0.000000e+00> : vector<8x32xf32>
      %98 = tpu.matmul %96, %97, %cst_57 {dimension_numbers = #tpu.dot_dimension_numbers<[1], [0], [0], [1], [0, 0, 1, 1], [], []>} : vector<8x32xbf16>, vector<32x32xbf16>, vector<8x32xf32> -> vector<8x32xf32>
      %c1 = arith.constant 1 : index
      %c0_58 = arith.constant 0 : index
      %99 = vector.load %arg7[%c1, %c0_58] : memref<4x32xf32, #tpu.memory_space<vmem>>, vector<1x32xf32>
      %100 = vector.broadcast %99 : vector<1x32xf32> to vector<8x32xf32>
      %101 = arith.addf %98, %100 : vector<8x32xf32>
      %c0_59 = arith.constant 0 : index
      %c0_60 = arith.constant 0 : index
      %102 = vector.load %arg5[%c0_59, %c0_60] : memref<32x32xbf16, #tpu.memory_space<vmem>>, vector<32x32xbf16>
      %cst_61 = arith.constant dense<0.000000e+00> : vector<8x32xf32>
      %103 = tpu.matmul %96, %102, %cst_61 {dimension_numbers = #tpu.dot_dimension_numbers<[1], [0], [0], [1], [0, 0, 1, 1], [], []>} : vector<8x32xbf16>, vector<32x32xbf16>, vector<8x32xf32> -> vector<8x32xf32>
      %c2 = arith.constant 2 : index
      %c0_62 = arith.constant 0 : index
      %104 = vector.load %arg7[%c2, %c0_62] : memref<4x32xf32, #tpu.memory_space<vmem>>, vector<1x32xf32>
      %105 = vector.broadcast %104 : vector<1x32xf32> to vector<8x32xf32>
      %106 = arith.addf %103, %105 : vector<8x32xf32>
      %107 = arith.truncf %101 : vector<8x32xf32> to vector<8x32xbf16>
      %c0_63 = arith.constant 0 : index
      %c0_64 = arith.constant 0 : index
      %108 = vector.load %arg9[%c0_63, %c0_64] : memref<8x32xbf16, #tpu.memory_space<vmem>>, vector<8x32xbf16>
      tpu.vector_store %arg9[%c0_63, %c0_64], %107 {strides = array<i32>} : memref<8x32xbf16, #tpu.memory_space<vmem>>, vector<8x32xbf16>,
      %109 = arith.truncf %106 : vector<8x32xf32> to vector<8x32xbf16>
      %c0_65 = arith.constant 0 : index
      %c0_66 = arith.constant 0 : index
      %110 = vector.load %arg10[%c0_65, %c0_66] : memref<8x32xbf16, #tpu.memory_space<vmem>>, vector<8x32xbf16>
      tpu.vector_store %arg10[%c0_65, %c0_66], %109 {strides = array<i32>} : memref<8x32xbf16, #tpu.memory_space<vmem>>, vector<8x32xbf16>,
    } else {
    }
    %c8_i32 = arith.constant 8 : i32
    %3 = arith.muli %arg1, %c8_i32 : i32
    %4 = tpu.assume_multiple %3, 8 : i32
    %c0 = arith.constant 0 : index
    %5 = arith.index_cast %4 : i32 to index
    %c0_1 = arith.constant 0 : index
    %6 = vector.load %arg2[%c0, %5, %c0_1] : memref<1x8x32xbf16, #tpu.memory_space<vmem>>, vector<1x8x32xbf16>
    %7 = vector.shape_cast %6 : vector<1x8x32xbf16> to vector<8x32xbf16>
    %c0_2 = arith.constant 0 : index
    %c0_3 = arith.constant 0 : index
    %8 = vector.load %arg3[%c0_2, %c0_3] : memref<32x32xbf16, #tpu.memory_space<vmem>>, vector<32x32xbf16>
    %cst = arith.constant dense<0.000000e+00> : vector<8x32xf32>
    %9 = tpu.matmul %7, %8, %cst {dimension_numbers = #tpu.dot_dimension_numbers<[1], [0], [0], [1], [0, 0, 1, 1], [], []>} : vector<8x32xbf16>, vector<32x32xbf16>, vector<8x32xf32> -> vector<8x32xf32>
    %c0_4 = arith.constant 0 : index
    %c0_5 = arith.constant 0 : index
    %10 = vector.load %arg7[%c0_4, %c0_5] : memref<4x32xf32, #tpu.memory_space<vmem>>, vector<1x32xf32>
    %11 = vector.broadcast %10 : vector<1x32xf32> to vector<8x32xf32>
    %12 = arith.addf %9, %11 : vector<8x32xf32>
    %13 = arith.truncf %12 : vector<8x32xf32> to vector<8x32xbf16>
    %14 = vector.extract_strided_slice %13 {offsets = [0, 0], sizes = [8, 8], strides = [1, 1]} : vector<8x32xbf16> to vector<8x8xbf16>
    %c0_6 = arith.constant 0 : index
    %c0_7 = arith.constant 0 : index
    %15 = vector.load %arg9[%c0_6, %c0_7] : memref<8x32xbf16, #tpu.memory_space<vmem>>, vector<8x8xbf16>
    %cst_8 = arith.constant dense<0.000000e+00> : vector<8x8xf32>
    %16 = tpu.matmul %14, %15, %cst_8 {dimension_numbers = #tpu.dot_dimension_numbers<[1], [1], [0], [0], [0, 0, 1, 0], [], []>} : vector<8x8xbf16>, vector<8x8xbf16>, vector<8x8xf32> -> vector<8x8xf32>
    %cst_9 = arith.constant dense<0xFF800000> : vector<8xf32>
    %17 = vector.multi_reduction <maximumf>, %16, %cst_9 [1] : vector<8x8xf32> to vector<8xf32>
    %18 = vector.shape_cast %17 : vector<8xf32> to vector<8x1xf32>
    %19 = vector.broadcast %18 : vector<8x1xf32> to vector<8x8xf32>
    %20 = arith.subf %16, %19 : vector<8x8xf32>
    %21 = math.exp %20 : vector<8x8xf32>
    %cst_10 = arith.constant dense<0.000000e+00> : vector<8xf32>
    %22 = vector.multi_reduction <add>, %21, %cst_10 [1] : vector<8x8xf32> to vector<8xf32>
    %23 = vector.shape_cast %22 : vector<8xf32> to vector<8x1xf32>
    %24 = tpu.reciprocal %23 {approx = true} : vector<8x1xf32> -> vector<8x1xf32>
    %25 = vector.broadcast %24 : vector<8x1xf32> to vector<8x8xf32>
    %26 = arith.mulf %21, %25 : vector<8x8xf32>
    %27 = arith.truncf %26 : vector<8x8xf32> to vector<8x8xbf16>
    %c0_11 = arith.constant 0 : index
    %c0_12 = arith.constant 0 : index
    %28 = vector.load %arg10[%c0_11, %c0_12] : memref<8x32xbf16, #tpu.memory_space<vmem>>, vector<8x8xbf16>
    %cst_13 = arith.constant dense<0.000000e+00> : vector<8x8xf32>
    %29 = tpu.matmul %27, %28, %cst_13 {dimension_numbers = #tpu.dot_dimension_numbers<[1], [0], [0], [1], [0, 0, 1, 1], [], []>} : vector<8x8xbf16>, vector<8x8xbf16>, vector<8x8xf32> -> vector<8x8xf32>
    %30 = arith.truncf %29 : vector<8x8xf32> to vector<8x8xbf16>
    %c0_14 = arith.constant 0 : index
    %c0_15 = arith.constant 0 : index
    %31 = vector.load %arg11[%c0_14, %c0_15] : memref<8x32xbf16, #tpu.memory_space<vmem>>, vector<8x8xbf16>
    tpu.vector_store %arg11[%c0_14, %c0_15], %30 {strides = array<i32>} : memref<8x32xbf16, #tpu.memory_space<vmem>>, vector<8x8xbf16>,
    %32 = vector.extract_strided_slice %13 {offsets = [0, 8], sizes = [8, 8], strides = [1, 1]} : vector<8x32xbf16> to vector<8x8xbf16>
    %c0_16 = arith.constant 0 : index
    %c8 = arith.constant 8 : index
    %33 = vector.load %arg9[%c0_16, %c8] : memref<8x32xbf16, #tpu.memory_space<vmem>>, vector<8x8xbf16>
    %cst_17 = arith.constant dense<0.000000e+00> : vector<8x8xf32>
    %34 = tpu.matmul %32, %33, %cst_17 {dimension_numbers = #tpu.dot_dimension_numbers<[1], [1], [0], [0], [0, 0, 1, 0], [], []>} : vector<8x8xbf16>, vector<8x8xbf16>, vector<8x8xf32> -> vector<8x8xf32>
    %cst_18 = arith.constant dense<0xFF800000> : vector<8xf32>
    %35 = vector.multi_reduction <maximumf>, %34, %cst_18 [1] : vector<8x8xf32> to vector<8xf32>
    %36 = vector.shape_cast %35 : vector<8xf32> to vector<8x1xf32>
    %37 = vector.broadcast %36 : vector<8x1xf32> to vector<8x8xf32>
    %38 = arith.subf %34, %37 : vector<8x8xf32>
    %39 = math.exp %38 : vector<8x8xf32>
    %cst_19 = arith.constant dense<0.000000e+00> : vector<8xf32>
    %40 = vector.multi_reduction <add>, %39, %cst_19 [1] : vector<8x8xf32> to vector<8xf32>
    %41 = vector.shape_cast %40 : vector<8xf32> to vector<8x1xf32>
    %42 = tpu.reciprocal %41 {approx = true} : vector<8x1xf32> -> vector<8x1xf32>
    %43 = vector.broadcast %42 : vector<8x1xf32> to vector<8x8xf32>
    %44 = arith.mulf %39, %43 : vector<8x8xf32>
    %45 = arith.truncf %44 : vector<8x8xf32> to vector<8x8xbf16>
    %c0_20 = arith.constant 0 : index
    %c8_21 = arith.constant 8 : index
    %46 = vector.load %arg10[%c0_20, %c8_21] : memref<8x32xbf16, #tpu.memory_space<vmem>>, vector<8x8xbf16>
    %cst_22 = arith.constant dense<0.000000e+00> : vector<8x8xf32>
    %47 = tpu.matmul %45, %46, %cst_22 {dimension_numbers = #tpu.dot_dimension_numbers<[1], [0], [0], [1], [0, 0, 1, 1], [], []>} : vector<8x8xbf16>, vector<8x8xbf16>, vector<8x8xf32> -> vector<8x8xf32>
    %48 = arith.truncf %47 : vector<8x8xf32> to vector<8x8xbf16>
    %c0_23 = arith.constant 0 : index
    %c8_24 = arith.constant 8 : index
    %49 = vector.load %arg11[%c0_23, %c8_24] : memref<8x32xbf16, #tpu.memory_space<vmem>>, vector<8x8xbf16>
    tpu.vector_store %arg11[%c0_23, %c8_24], %48 {strides = array<i32>} : memref<8x32xbf16, #tpu.memory_space<vmem>>, vector<8x8xbf16>,
    %50 = vector.extract_strided_slice %13 {offsets = [0, 16], sizes = [8, 8], strides = [1, 1]} : vector<8x32xbf16> to vector<8x8xbf16>
    %c0_25 = arith.constant 0 : index
    %c16 = arith.constant 16 : index
    %51 = vector.load %arg9[%c0_25, %c16] : memref<8x32xbf16, #tpu.memory_space<vmem>>, vector<8x8xbf16>
    %cst_26 = arith.constant dense<0.000000e+00> : vector<8x8xf32>
    %52 = tpu.matmul %50, %51, %cst_26 {dimension_numbers = #tpu.dot_dimension_numbers<[1], [1], [0], [0], [0, 0, 1, 0], [], []>} : vector<8x8xbf16>, vector<8x8xbf16>, vector<8x8xf32> -> vector<8x8xf32>
    %cst_27 = arith.constant dense<0xFF800000> : vector<8xf32>
    %53 = vector.multi_reduction <maximumf>, %52, %cst_27 [1] : vector<8x8xf32> to vector<8xf32>
    %54 = vector.shape_cast %53 : vector<8xf32> to vector<8x1xf32>
    %55 = vector.broadcast %54 : vector<8x1xf32> to vector<8x8xf32>
    %56 = arith.subf %52, %55 : vector<8x8xf32>
    %57 = math.exp %56 : vector<8x8xf32>
    %cst_28 = arith.constant dense<0.000000e+00> : vector<8xf32>
    %58 = vector.multi_reduction <add>, %57, %cst_28 [1] : vector<8x8xf32> to vector<8xf32>
    %59 = vector.shape_cast %58 : vector<8xf32> to vector<8x1xf32>
    %60 = tpu.reciprocal %59 {approx = true} : vector<8x1xf32> -> vector<8x1xf32>
    %61 = vector.broadcast %60 : vector<8x1xf32> to vector<8x8xf32>
    %62 = arith.mulf %57, %61 : vector<8x8xf32>
    %63 = arith.truncf %62 : vector<8x8xf32> to vector<8x8xbf16>
    %c0_29 = arith.constant 0 : index
    %c16_30 = arith.constant 16 : index
    %64 = vector.load %arg10[%c0_29, %c16_30] : memref<8x32xbf16, #tpu.memory_space<vmem>>, vector<8x8xbf16>
    %cst_31 = arith.constant dense<0.000000e+00> : vector<8x8xf32>
    %65 = tpu.matmul %63, %64, %cst_31 {dimension_numbers = #tpu.dot_dimension_numbers<[1], [0], [0], [1], [0, 0, 1, 1], [], []>} : vector<8x8xbf16>, vector<8x8xbf16>, vector<8x8xf32> -> vector<8x8xf32>
    %66 = arith.truncf %65 : vector<8x8xf32> to vector<8x8xbf16>
    %c0_32 = arith.constant 0 : index
    %c16_33 = arith.constant 16 : index
    %67 = vector.load %arg11[%c0_32, %c16_33] : memref<8x32xbf16, #tpu.memory_space<vmem>>, vector<8x8xbf16>
    tpu.vector_store %arg11[%c0_32, %c16_33], %66 {strides = array<i32>} : memref<8x32xbf16, #tpu.memory_space<vmem>>, vector<8x8xbf16>,
    %68 = vector.extract_strided_slice %13 {offsets = [0, 24], sizes = [8, 8], strides = [1, 1]} : vector<8x32xbf16> to vector<8x8xbf16>
    %c0_34 = arith.constant 0 : index
    %c24 = arith.constant 24 : index
    %69 = vector.load %arg9[%c0_34, %c24] : memref<8x32xbf16, #tpu.memory_space<vmem>>, vector<8x8xbf16>
    %cst_35 = arith.constant dense<0.000000e+00> : vector<8x8xf32>
    %70 = tpu.matmul %68, %69, %cst_35 {dimension_numbers = #tpu.dot_dimension_numbers<[1], [1], [0], [0], [0, 0, 1, 0], [], []>} : vector<8x8xbf16>, vector<8x8xbf16>, vector<8x8xf32> -> vector<8x8xf32>
    %cst_36 = arith.constant dense<0xFF800000> : vector<8xf32>
    %71 = vector.multi_reduction <maximumf>, %70, %cst_36 [1] : vector<8x8xf32> to vector<8xf32>
    %72 = vector.shape_cast %71 : vector<8xf32> to vector<8x1xf32>
    %73 = vector.broadcast %72 : vector<8x1xf32> to vector<8x8xf32>
    %74 = arith.subf %70, %73 : vector<8x8xf32>
    %75 = math.exp %74 : vector<8x8xf32>
    %cst_37 = arith.constant dense<0.000000e+00> : vector<8xf32>
    %76 = vector.multi_reduction <add>, %75, %cst_37 [1] : vector<8x8xf32> to vector<8xf32>
    %77 = vector.shape_cast %76 : vector<8xf32> to vector<8x1xf32>
    %78 = tpu.reciprocal %77 {approx = true} : vector<8x1xf32> -> vector<8x1xf32>
    %79 = vector.broadcast %78 : vector<8x1xf32> to vector<8x8xf32>
    %80 = arith.mulf %75, %79 : vector<8x8xf32>
    %81 = arith.truncf %80 : vector<8x8xf32> to vector<8x8xbf16>
    %c0_38 = arith.constant 0 : index
    %c24_39 = arith.constant 24 : index
    %82 = vector.load %arg10[%c0_38, %c24_39] : memref<8x32xbf16, #tpu.memory_space<vmem>>, vector<8x8xbf16>
    %cst_40 = arith.constant dense<0.000000e+00> : vector<8x8xf32>
    %83 = tpu.matmul %81, %82, %cst_40 {dimension_numbers = #tpu.dot_dimension_numbers<[1], [0], [0], [1], [0, 0, 1, 1], [], []>} : vector<8x8xbf16>, vector<8x8xbf16>, vector<8x8xf32> -> vector<8x8xf32>
    %84 = arith.truncf %83 : vector<8x8xf32> to vector<8x8xbf16>
    %c0_41 = arith.constant 0 : index
    %c24_42 = arith.constant 24 : index
    %85 = vector.load %arg11[%c0_41, %c24_42] : memref<8x32xbf16, #tpu.memory_space<vmem>>, vector<8x8xbf16>
    tpu.vector_store %arg11[%c0_41, %c24_42], %84 {strides = array<i32>} : memref<8x32xbf16, #tpu.memory_space<vmem>>, vector<8x8xbf16>,
    %c0_43 = arith.constant 0 : index
    %c0_44 = arith.constant 0 : index
    %86 = vector.load %arg11[%c0_43, %c0_44] : memref<8x32xbf16, #tpu.memory_space<vmem>>, vector<8x32xbf16>
    %c0_45 = arith.constant 0 : index
    %c0_46 = arith.constant 0 : index
    %87 = vector.load %arg6[%c0_45, %c0_46] : memref<32x32xbf16, #tpu.memory_space<vmem>>, vector<32x32xbf16>
    %cst_47 = arith.constant dense<0.000000e+00> : vector<8x32xf32>
    %88 = tpu.matmul %86, %87, %cst_47 {dimension_numbers = #tpu.dot_dimension_numbers<[1], [0], [0], [1], [0, 0, 1, 1], [], []>} : vector<8x32xbf16>, vector<32x32xbf16>, vector<8x32xf32> -> vector<8x32xf32>
    %c3 = arith.constant 3 : index
    %c0_48 = arith.constant 0 : index
    %89 = vector.load %arg7[%c3, %c0_48] : memref<4x32xf32, #tpu.memory_space<vmem>>, vector<1x32xf32>
    %90 = vector.broadcast %89 : vector<1x32xf32> to vector<8x32xf32>
    %91 = arith.addf %88, %90 : vector<8x32xf32>
    %c0_49 = arith.constant 0 : index
    %c0_50 = arith.constant 0 : index
    %c0_51 = arith.constant 0 : index
    %92 = vector.load %arg8[%c0_49, %c0_50, %c0_51] : memref<1x8x32xf32, #tpu.memory_space<vmem>>, vector<1x8x32xf32>
    %93 = vector.shape_cast %92 : vector<1x8x32xf32> to vector<8x32xf32>
    %94 = vector.shape_cast %91 : vector<8x32xf32> to vector<1x8x32xf32>
    tpu.vector_store %arg8[%c0_49, %c0_50, %c0_51], %94 {strides = array<i32>} : memref<1x8x32xf32, #tpu.memory_space<vmem>>, vector<1x8x32xf32>,
    return
  }
  func.func @transform_0(%arg0: i32, %arg1: i32) -> (i32, i32, i32) {
    %c0_i32 = arith.constant 0 : i32
    %c0_i32_0 = arith.constant 0 : i32
    %c0_i32_1 = arith.constant 0 : i32
    return %arg0, %c0_i32, %c0_i32_0 : i32, i32, i32
  }
  func.func @transform_1(%arg0: i32, %arg1: i32) -> (i32, i32) {
    %c0_i32 = arith.constant 0 : i32
    %c0_i32_0 = arith.constant 0 : i32
    %c0_i32_1 = arith.constant 0 : i32
    return %c0_i32, %c0_i32_0 : i32, i32
  }
  func.func @transform_2(%arg0: i32, %arg1: i32) -> (i32, i32) {
    %c0_i32 = arith.constant 0 : i32
    %c0_i32_0 = arith.constant 0 : i32
    %c0_i32_1 = arith.constant 0 : i32
    return %c0_i32, %c0_i32_0 : i32, i32
  }
  func.func @transform_3(%arg0: i32, %arg1: i32) -> (i32, i32) {
    %c0_i32 = arith.constant 0 : i32
    %c0_i32_0 = arith.constant 0 : i32
    %c0_i32_1 = arith.constant 0 : i32
    return %c0_i32, %c0_i32_0 : i32, i32
  }
  func.func @transform_4(%arg0: i32, %arg1: i32) -> (i32, i32) {
    %c0_i32 = arith.constant 0 : i32
    %c0_i32_0 = arith.constant 0 : i32
    %c0_i32_1 = arith.constant 0 : i32
    return %c0_i32, %c0_i32_0 : i32, i32
  }
  func.func @transform_5(%arg0: i32, %arg1: i32) -> (i32, i32) {
    %c0_i32 = arith.constant 0 : i32
    %c0_i32_0 = arith.constant 0 : i32
    %c0_i32_1 = arith.constant 0 : i32
    return %c0_i32, %c0_i32_0 : i32, i32
  }
  func.func @transform_6(%arg0: i32, %arg1: i32) -> (i32, i32, i32) {
    %c0_i32 = arith.constant 0 : i32
    %c0_i32_0 = arith.constant 0 : i32
    return %arg0, %arg1, %c0_i32 : i32, i32, i32
  }
}

</mosaic_0001>

<bundles_post_ra>
// kernel: tpu_custom_call.1
= control target key start
LH: loop header
LB: loop body
LE: loop exit
PB: predicated region body
PF: predicated region fallthrough
CT: control target
= control target key end

     0   :  { %s1625_s0 = inlined_call_operand.hbm [shape: bf16[2,8,32], index: 0, kind: input, shape index: {}]   ;;  %s1626_s1 = inlined_call_operand.hbm [shape: bf16[32,32], index: 1, kind: input, shape index: {}]   ;;  %s1627_s2 = inlined_call_operand.hbm [shape: bf16[32,32], index: 2, kind: input, shape index: {}]   ;;  %s1628_s3 = inlined_call_operand.hbm [shape: bf16[32,32], index: 3, kind: input, shape index: {}]   ;;  %s1629_s4 = inlined_call_operand.hbm [shape: bf16[32,32], index: 4, kind: input, shape index: {}]   ;;  %s1630_s5 = inlined_call_operand.vmem [shape: f32[4,32], index: 5, kind: input, shape index: {}]   ;;  %s1631_s6 = inlined_call_operand.hbm [shape: f32[2,8,32], index: 6, kind: output, shape index: {}]  }
   0x1   :  { %1632 = sst [smem:[#allocation19_spill]] %s1626_s1 }
   0x2   :  { %11 = vsyncpa [#allocation6], 0 }
   0x3   :  { %13 = vsyncpa [#allocation6 + $0x1], 0 }
   0x4   :  { %14 = vsyncpa [#allocation9], 0 }
   0x5   :  { %15 = vsyncpa [#allocation12], 0 }
   0x6   :  { %16 = vsyncpa [#allocation7], 0 }
   0x7   :  { %18 = vsyncpa [#allocation7 + $0x1], 0  ;;  %s1406_s21 = smov 0   ;;  %s1408_s22 = smov 0  }
   0x8   :  { %s1410_s23 = smov 0   ;;  %s1412_s24 = smov 0  }
   0x9   :  { %s1414_s25 = smov 0   ;;  %s1416_s26 = smov 0  }
   0xa LB: > { %s913_s27 = sadd.s32 4294967295, %s1357_s26   ;;  %p915_p0 = scmp.ge.s32.totalorder %s1357_s26, 1  ;;  %s1357_s26 = sphi %s1416_s26, %s24_s26   ;;  %s1353_s25 = sphi %s1414_s25, %s1644_s25   ;;  %s1349_s24 = sphi %s1412_s24, %s1643_s24   ;;  %s1345_s23 = sphi %s1410_s23, %s1642_s23   ;;  %s1341_s22 = sphi %s1408_s22, %s1641_s22   ;;  %s1337_s21 = sphi %s1406_s21, %s1640_s21  }
   0xb   : > { %p1440_p1 = scmp.eq.s32.totalorder %s913_s27, 0  ;;  %p200_p2 = scmp.lt.s32.totalorder %s1357_s26, 3 }
   0xc   : > { %s1634_s1 = sld [smem:[#allocation19_spill]]  ;;  %s1359_s9 = smov [#allocation8]  }
   0xd   : > { %p1448_p3 = pnand %p915_p0, %p200_p2  ;;  %s213_s10 = sshll.u32 %s1359_s9, 4  ;;  %s214_s10 = int_to_ptr.vmem [resolvable:$true] %s213_s10 }
   0xe   : > { %p920_p6 = scmp.ge.s32.totalorder %s1357_s26, 2  ;;  %s239_s14 = sshll.u32 %s1628_s3, 4  ;;  %s240_s14 = int_to_ptr.hbm [resolvable:$true] %s239_s14 }
   0xf   : > { %p1006_p4 = pneg %p1448_p3  ;;  %s1360_s15 = smov 64  }
  0x10   : > { %s1361_s16 = smov 4   ;;  %s1362_s17 = smov [#allocation11]  }
  0x11   : > { %p1456_p5 = pnand %p1006_p4, %p1440_p1  ;;  %s241_s18 = sshll.u32 %s1362_s17, 4  ;;  %s242_s18 = int_to_ptr.vmem [resolvable:$true] %s241_s18 }
  0x12   : > { %s211_s7 = sshll.u32 %s1634_s1, 4  ;;  %s225_s29 = sshll.u32 %s1627_s2, 4  ;;  %s212_s7 = int_to_ptr.hbm [resolvable:$true] %s211_s7  ;;  %s226_s29 = int_to_ptr.hbm [resolvable:$true] %s225_s29 }
  0x13   : > { %1009 = dma.hbm_to_vmem [thread:$0]  (!%p1456_p5), %s212_s7, 256, %s214_s10, [#allocation9], %s1360_s15, %s1360_s15, %s1361_s16  }
  0x14   : > { %1015 = dma.hbm_to_vmem [thread:$0]  (!%p1456_p5), %s240_s14, 256, %s242_s18, [#allocation12], %s1360_s15, %s1360_s15, %s1361_s16  }
  0x15   : > { %s253_s7 = sshll.u32 %s1629_s4, 4  ;;  %s1363_s10 = smov [#allocation10]   ;;  %s254_s7 = int_to_ptr.hbm [resolvable:$true] %s253_s7 }
  0x16   : > { %s227_s12 = sshll.u32 %s1363_s10, 4  ;;  %s1364_s13 = smov [#allocation13]   ;;  %s228_s12 = int_to_ptr.vmem [resolvable:$true] %s227_s12 }
  0x17   : > { %1012 = dma.hbm_to_vmem [thread:$0]  (!%p1456_p5), %s226_s29, 256, %s228_s12, [#allocation9], %s1360_s15, %s1360_s15, %s1361_s16  }
  0x18   : > { %s255_s17 = sshll.u32 %s1364_s13, 4  ;;  %s36_s14 = sadd.s32 1, %s1353_s25  ;;  %s256_s17 = int_to_ptr.vmem [resolvable:$true] %s255_s17 }
  0x19   : > { %1018 = dma.hbm_to_vmem [thread:$0]  (!%p1456_p5), %s254_s7, 256, %s256_s17, [#allocation12], %s1360_s15, %s1360_s15, %s1361_s16  }
  0x1a   : > { %s914_s18 = sadd.s32 4294967294, %s1357_s26   ;;  %p38_p7 = scmp.ge.s32.totalorder %s36_s14, 2 }
  0x1b   : > { %s43_s19 = sadd.s32 1, %s1345_s23  ;;  %p50_p8 = scmp.ne.s32.totalorder %s1345_s23, %s1341_s22 }
  0x1c   : > { %s1646_s14 = smov (%p38_p7, %s36_s14), 0  ;;  %p51_p9 = scmp.eq.s32.totalorder %s1357_s26, 0 }
  0x1d   : > { %p56_p10 = scmp.ne.s32.totalorder %s1341_s22, %s1337_s21  ;;  %s40_s20 = ssub.s32 %s1353_s25, %s1646_s14 }
  0x1e   : > { %p187_p11 = scmp.eq.s32.totalorder %s913_s27, 1  ;;  %p41_p12 = scmp.eq.s32.totalorder %s40_s20, 0 }
  0x1f   : > { %p1494_p13 = por %p1440_p1, %p56_p10  ;;  %p193_p2 = scmp.eq.s32.totalorder %s914_s18, 1 }
  0x20   : > { %p1498_p0 = por %p187_p11, %p50_p8  ;;  %p52_p4 = por %p51_p9, %p50_p8 }
  0x21   : > { %s1503_s16 = scalar_select %p41_p12, %s1345_s23, %s43_s19  }
  0x22   : > { %p1505_p5 = por %p193_p2, %p56_p10  ;;  %s272_s30 = sand.u32 1, %s1345_s23  }
  0x23   : > { %s922_s27 = sshll.u32 %s1353_s25, 2  ;;  %p1031_p7 = scmp.lt.s32.totalorder %s1357_s26, 2 }
  0x24   : > { %s921_s9 = sshll.u32 %s272_s30, 2  ;;  %s280_s12 = scalar_lea.hbm %s1625_s0, %s922_s27 }
  0x25   : > { %s282_s13 = sshll.u32 %s280_s12, 4  ;;  %s276_s17 = scalar_lea.vmem [#allocation5], %s921_s9  ;;  %s283_s13 = int_to_ptr.hbm [resolvable:$true] %s282_s13 }
  0x26   : > { %s284_s20 = sshll.u32 %s276_s17, 4  ;;  %p1020_p11 = pnand %p1031_p7, %p52_p4  ;;  %s285_s20 = int_to_ptr.vmem [resolvable:$true] %s284_s20 }
  0x27   : > { %s273_s18 = scalar_lea.sflag [#allocation6], %s272_s30  ;;  %293 = sbr.rel (%p1448_p3) target bundleno = 1139 (0x473), region = 44 }
  0x28   : > { %1022 = dma.hbm_to_vmem [thread:$0]  (!%p1020_p11), %s283_s13, 64, %s285_s20, %s273_s18  }
  0x29   : > { %s1518_s19 = sand.u32 (!%p1448_p3), 1, %s1341_s22  }
  0x2a   : > { %s924_s1 = sshll.u32 (!%p1448_p3), %s1518_s19, 2  ;;  %s296_s7 = scalar_lea.sflag (!%p1448_p3), [#allocation6], %s1518_s19 }
  0x2b   : > { %s299_s27 = scalar_lea.vmem (!%p1448_p3), [#allocation5], %s924_s1 }
  0x2c   : > { %1320 = dma.done.wait (%p1494_p13), %s296_s7, 64  }
  0x2d   : > { %1322 = vsyncadd (%p1494_p13), %s296_s7, 4294967232 }
  0x2e   : > { %1324 = dma.done.wait (%p1440_p1), [#allocation9], 512  }
  0x2f   : > { %1326 = vsyncadd (%p1440_p1), [#allocation9], 4294966784 }
  0x30   : > { %1328 = dma.done.wait (%p1440_p1), [#allocation12], 512  }
  0x31   : > { %1330 = vsyncadd (%p1440_p1), [#allocation12], 4294966784  ;;  %v979_v0 = vld [vmem:[#allocation10 + $0x8] sm:$0xff]  ;;  %v983_v1 = vld [vmem:[#allocation8 + $0x8] sm:$0xff]  ;;  %vm373_vm0 = vcmask 261120   ;;  %vm422_vm1 = vcmask 257024  }
  0x32   : > { %v978_v2 = vld [vmem:[#allocation10] sm:$0xff]  ;;  %383 = vmatpush.bf16.msra.mxu0 %v979_v0  ;;  %460 = vmatpush.bf16.msra.mxu2 %v983_v1  ;;  %v982_v3 = vld [vmem:[#allocation8] sm:$0xff]  ;;  %v354_v4 = vld [vmem:[%s299_s27] sm:$0xf]  ;;  %vm469_vm2 = vcmask 64512   ;;  %s1365_s30 = smov 112  }
  0x33   : > { %v431_v5 = vld [vmem:[%s299_s27] sm:$0xf]  ;;  %v1097_v6 = vld [vmem:[%s1630_s5 + $0x1] ss:$0 sm:$0xff]  ;;  %v1098_v10 = vld [vmem:[%s1630_s5] ss:$0 sm:$0xff] }
  0x34   : > { %s1366_s9 = smov 120   ;;  %s1367_s10 = smov 104   ;;  %v981_v29 = vld [vmem:[#allocation11 + $0x8] sm:$0xff]  ;;  %v980_v30 = vld [vmem:[#allocation11] sm:$0xff]  ;;  %vm505_vm3 = vcmask 1043456   ;;  %vm523_vm4 = vcmask 60416  }
  0x35   : > { %414 = vmatpush.bf16.msra.mxu1 %v981_v29  ;;  %v1099_v43 = vld [vmem:[%s1630_s5 + $0x2] ss:$0 sm:$0xff]  ;;  %s1368_s17 = smov 8   ;;  %s1369_s20 = smov 24   ;;  %vm597_vm5 = vcmask 126016   ;;  %vm668_vm6 = vcmask 191616  }
  0x36   : > { %384 = vmatpush.bf16.msra.mxu0 %v978_v2  ;;  %461 = vmatpush.bf16.msra.mxu2 %v982_v3  ;;  %s1370_s18 = smov 16   ;;  %vm739_vm7 = vcmask 257216   ;;  %s975_s7 = sshll.u32 %s1349_s24, 3 }
  0x37   : > { %s929_s27 = sshll.u32 %s1518_s19, 3  ;;  %s789_s28 = scalar_lea.hbm %s1631_s6, %s975_s7 }
  0x38   : > { %s793_s12 = sshll.u32 %s789_s28, 4  ;;  %s778_s24 = scalar_lea.sflag [#allocation7], %s1518_s19  ;;  %s794_s12 = int_to_ptr.hbm [resolvable:$true] %s793_s12 }
  0x39   : > { %938 = vmatmul.msk.bf16.vlgmr.msra.gmra.mxu0 %vm373_vm0, %v354_v4  ;;  %956 = vmatmul.msk.bf16.vlgmr.msra.gmra.mxu2 %vm373_vm0, %v431_v5  ;;  %s1281_s13 = sshra.s32 %s794_s12, 4  ;;  %s1287_s7 = scalar_lea.hbm %s1631_s6, 16  ;;  %s1282_s13 = int_to_ptr.hbm [resolvable:$true] %s1281_s13 }
  0x3a   : > { %415 = vmatpush.bf16.msra.mxu1 %v980_v30  ;;  %p1288_p9 = scmp.lt.s32.totalorder %s1282_s13, %s1631_s6 }
  0x3d   : > { %947 = vmatmul.msk.bf16.vlgmr.msra.gmra.mxu1 %vm373_vm0, %v354_v4 }
  0xb6   : > { %v386_v7 = vpop.f32.mrf.mxu0 }
  0xb7   : > { %v387_v8 = vadd.f32 %v1097_v6, %v386_v7 }
  0xb9   : > { %v421_v9 = vpack.c.bf16 %v387_v8, %v387_v8 }
  0xba   : > { %v417_v44 = vpop.f32.mrf.mxu1 }
  0xbb   : > { %423 = vst.msk [vmem:[#allocation2] sm:$0xf] %vm422_vm1, %v421_v9  ;;  %v418_v45 = vadd.f32 %v1099_v43, %v417_v44 }
  0xbc   : > { %v463_v11 = vpop.f32.mrf.mxu2 }
  0xbd   : > { %v464_v12 = vadd.f32 %v1098_v10, %v463_v11  ;;  %v424_v46 = vpack.c.bf16 %v418_v45, %v418_v45 }
  0xbe   : > { %v388_v13 = vpop.f32.mrf.mxu0 }
  0xbf   : > { %v467_v14 = vpack.c.bf16 %v464_v12, %v464_v12  ;;  %425 = vst.msk [vmem:[#allocation3] sm:$0xf] %vm422_vm1, %v424_v46 }
  0xc1   : > { %v527_v15 = vunpack.c.l.b16 %v467_v14 }
  0xc2   : > { %v468_v16 = vld [vmem:[#allocation2] sm:$0xf]  ;;  %v419_v47 = vpop.f32.mrf.mxu1 }
  0xc3   : > { %v599_v17 = vld [vmem:[#allocation2] sm:$0xf]  ;;  %v528_v19 = vpack.c.b16 %v527_v15, %v527_v15  ;;  %v474_v20 = vsel %vm469_vm2, %v468_v16, 0 }
  0xc4   : > { %v525_v18 = vld [vmem:[#allocation2] sm:$0xf]  ;;  %v603_v21 = vunpack.c.l.b16 %v599_v17  ;;  %483 = vmatpush.bf16.xpose.msra.mxu3 %v474_v20  ;;  %v465_v23 = vpop.f32.mrf.mxu2 }
  0xc5   : > { %v532_v22 = vunpack.c.l.b16 %v525_v18  ;;  %600 = vrot.lane.b32.xlu2 %v528_v19, %s1365_s30  ;;  %v670_v26 = vld [vmem:[#allocation2] sm:$0xf] }
  0xc6   : > { %v604_v24 = vpack.c.b16 %v603_v21, %v603_v21  ;;  %v674_v27 = vunpack.c.l.b16 %v670_v26  ;;  %v501_v48 = vld [vmem:[#allocation3] sm:$0xf] }
  0xc7   : > { %v533_v25 = vpack.c.b16 %v532_v22, %v532_v22  ;;  %v507_v49 = vsel %vm505_vm3, %v501_v48, 0  ;;  %v567_v0 = vld [vmem:[#allocation3] sm:$0xf] }
  0xc8   : > { %605 = vrot.lane.b32.xlu1 %v604_v24, %s1365_s30  ;;  %v675_v28 = vpack.c.b16 %v674_v27, %v674_v27  ;;  %516 = vmatpush.bf16.msrb.mxu0 %v507_v49  ;;  %v569_v1 = vunpack.c.l.b16 %v567_v0  ;;  %v709_v24 = vld [vmem:[#allocation3] sm:$0xf]  ;;  %v1100_v0 = vld [vmem:[%s1630_s5 + $0x3] ss:$0 sm:$0xff] }
  0xc9   : > { %534 = vrot.lane.b32.xlu0 %v533_v25, %s1366_s9  ;;  %v711_v25 = vunpack.c.l.b16 %v709_v24  ;;  %v638_v27 = vld [vmem:[#allocation3] sm:$0xf] }
  0xca   : > { %v570_v2 = vpack.c.b16 %v569_v1, %v569_v1 }
  0xcb   : > { %957 = vmatmul.msk.bf16.vlgmr.msra.gmra.mxu3 %vm469_vm2, %v467_v14  ;;  %v712_v26 = vpack.c.b16 %v711_v25, %v711_v25 }
  0xcd   : > { %671 = vrot.lane.b32.xlu2 %v528_v19, %s1367_s10 }
  0xd0   : > { %676 = vrot.lane.b32.xlu1 %v675_v28, %s1367_s10  ;;  %v640_v28 = vunpack.c.l.b16 %v638_v27 }
  0xd1   : > { %529 = vrot.lane.b32.xlu0 %v528_v19, %s1366_s9 }
  0xd2   : > { %v641_v29 = vpack.c.b16 %v640_v28, %v640_v28 }
 0x11f   : > { %v601_v35 = vpop.permute.xlu2 %600 }
 0x127   : > { %v672_v41 = vpop.permute.xlu2 %671 }
 0x13a   : > { %v606_v31 = vpop.permute.xlu1 %605 }
 0x13b   : > { %v535_v32 = vpop.permute.xlu0 %534  ;;  %v611_v34 = vsel %vm469_vm2, %v606_v31, 0 }
 0x13c   : > { %v540_v33 = vsel %vm469_vm2, %v535_v32, 0  ;;  %620 = vmatpush.bf16.xpose.msrb.mxu3 %v611_v34 }
 0x13d   : > { %549 = vmatpush.bf16.xpose.msrb.mxu1 %v540_v33 }
 0x142   : > { %v677_v36 = vpop.permute.xlu1 %676 }
 0x143   : > { %v530_v37 = vpop.permute.xlu0 %529  ;;  %v682_v38 = vsel %vm469_vm2, %v677_v36, 0  ;;  %961 = vmatmul.msk.bf16.vlgmr.msrb.gmra.mxu3 %vm469_vm2, %v601_v35 }
 0x144   : > { %959 = vmatmul.msk.bf16.vlgmr.msrb.gmra.mxu1 %vm469_vm2, %v530_v37 }
 0x145   : > { %691 = vmatpush.bf16.xpose.msra.mxu1 %v682_v38 }
 0x14e   : > { %v485_v39 = vpop.f32.mrf.mxu3 }
 0x14f   : > { %v489_v40 = vsel %vm469_vm2, %v485_v39, -inf }
 0x150   : > { %490 = vmax.xlane.f32.xlu1 %v489_v40 }
 0x154   : > { %963 = vmatmul.msk.bf16.vlgmr.msra.gmra.mxu1 %vm469_vm2, %v672_v41 }
 0x156   : > { %v487_v42 = vpop.f32.mrf.mxu3 }
 0x1c1   : > { %v551_v50 = vpop.f32.mrf.mxu1 }
 0x1c2   : > { %v555_v51 = vsel %vm469_vm2, %v551_v50, -inf }
 0x1c3   : > { %556 = vmax.xlane.f32.xlu0 %v555_v51  ;;  %v491_v52 = vpop.xlane.xlu1 %490 }
 0x1c4   : > { %v492_v53 = vsub.f32 %v485_v39, %v491_v52 }
 0x1c6   : > { %v622_v54 = vpop.f32.mrf.mxu3  ;;  %v493_v55 = vmul.f32 1.442695, %v492_v53 }
 0x1c7   : > { %v626_v63 = vsel %vm469_vm2, %v622_v54, -inf }
 0x1c8   : > { %1101 = vpow2.f32 %v493_v55 }
 0x1c9   : > { %v553_v56 = vpop.f32.mrf.mxu1 }
 0x1ce   : > { %v624_v57 = vpop.f32.mrf.mxu3  ;;  %v1102_v58 = vpop.eup %1101 }
 0x1cf   : > { %v495_v60 = vsel %vm469_vm2, %v1102_v58, 0.0 }
 0x1d0   : > { %496 = vadd.xlane.f32.xlu1 %v495_v60  ;;  %v984_v60 = vld [vmem:[#allocation13] sm:$0xff] }
 0x1d1   : > { %v693_v59 = vpop.f32.mrf.mxu1 }
 0x1d2   : > { %v697_v61 = vsel %vm469_vm2, %v693_v59, -inf }
 0x1d3   : > { %698 = vmax.xlane.f32.xlu2 %v697_v61 }
 0x1d9   : > { %v695_v62 = vpop.f32.mrf.mxu1 }
 0x1db   : > { %627 = vmax.xlane.f32.xlu2 %v626_v63 }
 0x1f3   : > { %571 = vrot.lane.b32.xlu2 %v570_v2, %s1366_s9  ;;  %s348_s9 = scalar_lea.vmem [#allocation14], %s929_s27 }
 0x236   : > { %v557_v3 = vpop.xlane.xlu0 %556 }
 0x237   : > { %v558_v4 = vsub.f32 %v551_v50, %v557_v3 }
 0x239   : > { %v559_v5 = vmul.f32 1.442695, %v558_v4 }
 0x23b   : > { %1103 = vpow2.f32 %v559_v5 }
 0x241   : > { %v1104_v6 = vpop.eup %1103 }
 0x242   : > { %v561_v7 = vsel %vm469_vm2, %v1104_v6, 0.0 }
 0x243   : > { %562 = vadd.xlane.f32.xlu0 %v561_v7  ;;  %v497_v8 = vpop.xlane.xlu1 %496 }
 0x244   : > { %1105 = vrcp.f32 %v497_v8 }
 0x246   : > { %v699_v9 = vpop.xlane.xlu2 %698 }
 0x247   : > { %v700_v10 = vsub.f32 %v693_v59, %v699_v9  ;;  %v985_v59 = vld [vmem:[#allocation13 + $0x8] sm:$0xff] }
 0x248   : > { %769 = vmatpush.bf16.msra.mxu3 %v985_v59 }
 0x249   : > { %v701_v11 = vmul.f32 1.442695, %v700_v10 }
 0x24a   : > { %v1106_v12 = vpop.eup %1105 }
 0x24b   : > { %1107 = vpow2.f32 %v701_v11  ;;  %v499_v13 = vmul.f32 %v1106_v12, %v1102_v58 }
 0x24c   : > { %770 = vmatpush.bf16.msra.mxu3 %v984_v60 }
 0x24d   : > { %v500_v16 = vpack.c.bf16 %v499_v13, %v499_v13 }
 0x24e   : > { %v628_v14 = vpop.xlane.xlu2 %627 }
 0x24f   : > { %v629_v15 = vsub.f32 %v622_v54, %v628_v14  ;;  %958 = vmatmul.msk.bf16.vlgmr.msrb.gmra.mxu0 %vm469_vm2, %v500_v16 }
 0x251   : > { %v1108_v17 = vpop.eup %1107  ;;  %v630_v18 = vmul.f32 1.442695, %v629_v15 }
 0x252   : > { %v703_v19 = vsel %vm469_vm2, %v1108_v17, 0.0 }
 0x253   : > { %1109 = vpow2.f32 %v630_v18  ;;  %704 = vadd.xlane.f32.xlu0 %v703_v19 }
 0x256   : > { %v572_v20 = vpop.permute.xlu2 %571 }
 0x257   : > { %v577_v21 = vsel %vm505_vm3, %v572_v20, 0 }
 0x258   : > { %586 = vmatpush.bf16.msrb.mxu2 %v577_v21 }
 0x259   : > { %v1110_v22 = vpop.eup %1109 }
 0x25a   : > { %v632_v23 = vsel %vm469_vm2, %v1110_v22, 0.0 }
 0x25b   : > { %633 = vadd.xlane.f32.xlu1 %v632_v23 }
 0x267   : > { %713 = vrot.lane.b32.xlu0 %v712_v26, %s1367_s10  ;;  %s791_s10 = sshll.u32 %s348_s9, 4  ;;  %s792_s10 = int_to_ptr.vmem [resolvable:$true] %s791_s10 }
 0x274   : > { %642 = vrot.lane.b32.xlu1 %v641_v29, %s1365_s30 }
 0x2b6   : > { %v563_v30 = vpop.xlane.xlu0 %562 }
 0x2b7   : > { %1111 = vrcp.f32 %v563_v30 }
 0x2bd   : > { %v1112_v31 = vpop.eup %1111 }
 0x2be   : > { %v565_v32 = vmul.f32 %v1112_v31, %v1104_v6 }
 0x2c0   : > { %v566_v33 = vpack.c.bf16 %v565_v32, %v565_v32 }
 0x2c2   : > { %960 = vmatmul.msk.bf16.vlgmr.msrb.gmra.mxu2 %vm469_vm2, %v566_v33 }
 0x2c6   : > { %v705_v34 = vpop.xlane.xlu0 %704 }
 0x2c7   : > { %1113 = vrcp.f32 %v705_v34 }
 0x2cc   : > { %v518_v35 = vpop.f32.mrf.mxu0 }
 0x2cd   : > { %v522_v36 = vpack.c.bf16 %v518_v35, %v518_v35  ;;  %v1114_v37 = vpop.eup %1113 }
 0x2ce   : > { %v707_v39 = vmul.f32 %v1114_v37, %v1108_v17  ;;  %v634_v40 = vpop.xlane.xlu1 %633 }
 0x2cf   : > { %524 = vst.msk [vmem:[#allocation4] sm:$0xf] %vm523_vm4, %v522_v36  ;;  %1115 = vrcp.f32 %v634_v40 }
 0x2d0   : > { %v708_v43 = vpack.c.bf16 %v707_v39, %v707_v39 }
 0x2d4   : > { %v520_v38 = vpop.f32.mrf.mxu0 }
 0x2d5   : > { %v1116_v44 = vpop.eup %1115 }
 0x2d6   : > { %v636_v45 = vmul.f32 %v1116_v44, %v1110_v22 }
 0x2d8   : > { %v637_v48 = vpack.c.bf16 %v636_v45, %v636_v45 }
 0x2d9   : > { %v714_v41 = vpop.permute.xlu0 %713 }
 0x2da   : > { %v719_v42 = vsel %vm505_vm3, %v714_v41, 0 }
 0x2db   : > { %728 = vmatpush.bf16.msra.mxu2 %v719_v42 }
 0x2de   : > { %964 = vmatmul.msk.bf16.vlgmr.msra.gmra.mxu2 %vm469_vm2, %v708_v43 }
 0x2e6   : > { %v643_v46 = vpop.permute.xlu1 %642 }
 0x2e7   : > { %v648_v47 = vsel %vm505_vm3, %v643_v46, 0 }
 0x2e8   : > { %657 = vmatpush.bf16.msra.mxu0 %v648_v47 }
 0x2eb   : > { %962 = vmatmul.msk.bf16.vlgmr.msra.gmra.mxu0 %vm469_vm2, %v637_v48 }
 0x345   : > { %v588_v49 = vpop.f32.mrf.mxu2 }
 0x346   : > { %v592_v50 = vpack.c.bf16 %v588_v49, %v588_v49 }
 0x348   : > { %594 = vrot.lane.b32.xlu2 %v592_v50, %s1368_s17  ;;  %s1283_s17 = scalar_lea.hbm %s1282_s13, 8 }
 0x349   : > { %p1284_p1 = scmp.ne.s32.totalorder %s1282_s13, %s1283_s17  ;;  %p1289_p10 = scmp.lt.s32.totalorder %s1287_s7, %s1283_s17 }
 0x34b   : > { %p1285_p3 = pnand %p1284_p1, %p1498_p0  ;;  %p1290_p12 = por %p1289_p10, %p1288_p9 }
 0x34d   : > { %v590_v51 = vpop.f32.mrf.mxu2  ;;  %p1286_p8 = pneg %p1285_p3 }
 0x34f   : > { %p1291_p13 = pnand %p1290_p12, %p1286_p8 }
 0x361   : > { %v730_v52 = vpop.f32.mrf.mxu2 }
 0x362   : > { %v734_v53 = vpack.c.bf16 %v730_v52, %v730_v52 }
 0x364   : > { %736 = vrot.lane.b32.xlu2 %v734_v53, %s1369_s20 }
 0x368   : > { %v659_v54 = vpop.f32.mrf.mxu0 }
 0x369   : > { %v663_v55 = vpack.c.bf16 %v659_v54, %v659_v54  ;;  %v732_v56 = vpop.f32.mrf.mxu2 }
 0x36b   : > { %665 = vrot.lane.b32.xlu0 %v663_v55, %s1370_s18 }
 0x370   : > { %v661_v57 = vpop.f32.mrf.mxu0 }
 0x3a2   : > { %v595_v58 = vpop.permute.xlu2 %594 }
 0x3a3   : > { %598 = vst.msk [vmem:[#allocation4] sm:$0xf] %vm597_vm5, %v595_v58 }
 0x3be   : > { %v737_v62 = vpop.permute.xlu2 %736 }
 0x3dd   : > { %v666_v61 = vpop.permute.xlu0 %665 }
 0x3de   : > { %669 = vst.msk [vmem:[#allocation4] sm:$0xf] %vm668_vm6, %v666_v61 }
 0x3df   : > { %740 = vst.msk [vmem:[#allocation4] sm:$0xf] %vm739_vm7, %v737_v62 }
 0x3e6   : > { %v741_v63 = vld [vmem:[#allocation4] sm:$0xf] }
 0x3e7   : > { %973 = vmatmul.msk.bf16.vlgmr.msra.gmra.mxu3 %vm373_vm0, %v741_v63 }
 0x46a   : > { %v772_v1 = vpop.f32.mrf.mxu3 }
 0x46b   : > { %v773_v2 = vadd.f32 %v1100_v0, %v772_v1 }
 0x46d   : > { %776 = vst.msk [vmem:[%s348_s9] sm:$0xff] %vm373_vm0, %v773_v2 }
 0x46e   : > { %1294 = shalt.err (!%p1291_p13)
}
 0x46f   : > { %1004 = dma.vmem_to_hbm [thread:$0]  (%p1498_p0), %s792_s10, 128, %s794_s12, %s778_s24  }
 0x472   : > { %v774_v3 = vpop.f32.mrf.mxu3 }
 0x473 PF: > { %s805_s19 = sand.u32 1, %s1337_s21   ;;  %p1024_p2 = pnand %p920_p6, %p1505_p5 }
 0x474   : > { %s806_s8 = scalar_lea.sflag [#allocation7], %s805_s19 }
 0x475   : > { %p1025_p4 = pneg %p1024_p2 }
 0x477   : > { %1332 = dma.done.wait (%p1025_p4), %s806_s8, 128  }
 0x478   : > { %1334 = vsyncadd (%p1025_p4), %s806_s8, 4294967168  ;;  %s24_s26 = sadd.s32 1, %s1357_s26   ;;  %s1640_s21 = smov %s1341_s22 }
 0x479   : > { %p21_p7 = scmp.ge.s32.totalorder %s24_s26, 4   ;;  %s1641_s22 = smov %s1345_s23 }
 0x47a   : > { %s1642_s23 = smov %s1503_s16  ;;  %s1643_s24 = smov %s1353_s25 }
 0x47b   : > { %s1644_s25 = smov %s1646_s14  ;;  %23 = sbr.rel (!%p21_p7) target bundleno = 10 (0xa), region = 110 }
 0x480   :  { %812 = vsyncpa [#allocation6], 1 }
 0x481   :  { %814 = vsyncpa [#allocation6 + $0x1], 1 }
 0x482   :  { %815 = vsyncpa [#allocation9], 1 }
 0x483   :  { %816 = vsyncpa [#allocation12], 1 }
 0x484   :  { %817 = vsyncpa [#allocation7], 1 }
 0x485   :  { %819 = vsyncpa [#allocation7 + $0x1], 1 }

// kernel: tpu_custom_call.1
= control target key start
LH: loop header
LB: loop body
LE: loop exit
PB: predicated region body
PF: predicated region fallthrough
CT: control target
= control target key end

     0   :  { %s1625_s0 = inlined_call_operand.hbm [shape: bf16[2,8,32], index: 0, kind: input, shape index: {}]   ;;  %s1626_s1 = inlined_call_operand.hbm [shape: bf16[32,32], index: 1, kind: input, shape index: {}]   ;;  %s1627_s2 = inlined_call_operand.hbm [shape: bf16[32,32], index: 2, kind: input, shape index: {}]   ;;  %s1628_s3 = inlined_call_operand.hbm [shape: bf16[32,32], index: 3, kind: input, shape index: {}]   ;;  %s1629_s4 = inlined_call_operand.hbm [shape: bf16[32,32], index: 4, kind: input, shape index: {}]   ;;  %s1630_s5 = inlined_call_operand.vmem [shape: f32[4,32], index: 5, kind: input, shape index: {}]   ;;  %s1631_s6 = inlined_call_operand.hbm [shape: f32[2,8,32], index: 6, kind: output, shape index: {}]  }
   0x1   :  { %1632 = sst [smem:[#allocation19_spill]] %s1626_s1 }
   0x2   :  { %11 = vsyncpa [#allocation6], 0 }
   0x3   :  { %13 = vsyncpa [#allocation6 + $0x1], 0 }
   0x4   :  { %14 = vsyncpa [#allocation9], 0 }
   0x5   :  { %15 = vsyncpa [#allocation12], 0 }
   0x6   :  { %16 = vsyncpa [#allocation7], 0 }
   0x7   :  { %18 = vsyncpa [#allocation7 + $0x1], 0  ;;  %s1406_s21 = smov 0   ;;  %s1408_s22 = smov 0  }
   0x8   :  { %s1410_s23 = smov 0   ;;  %s1412_s24 = smov 0  }
   0x9   :  { %s1414_s25 = smov 0   ;;  %s1416_s26 = smov 0  }
   0xa LB: > { %s913_s27 = sadd.s32 4294967295, %s1357_s26   ;;  %p915_p0 = scmp.ge.s32.totalorder %s1357_s26, 1  ;;  %s1357_s26 = sphi %s1416_s26, %s24_s26   ;;  %s1353_s25 = sphi %s1414_s25, %s1644_s25   ;;  %s1349_s24 = sphi %s1412_s24, %s1643_s24   ;;  %s1345_s23 = sphi %s1410_s23, %s1642_s23   ;;  %s1341_s22 = sphi %s1408_s22, %s1641_s22   ;;  %s1337_s21 = sphi %s1406_s21, %s1640_s21  }
   0xb   : > { %p1440_p1 = scmp.eq.s32.totalorder %s913_s27, 0  ;;  %p200_p2 = scmp.lt.s32.totalorder %s1357_s26, 3 }
   0xc   : > { %s1634_s1 = sld [smem:[#allocation19_spill]]  ;;  %s1359_s9 = smov [#allocation8]  }
   0xd   : > { %p1448_p3 = pnand %p915_p0, %p200_p2  ;;  %s213_s10 = sshll.u32 %s1359_s9, 4  ;;  %s214_s10 = int_to_ptr.vmem [resolvable:$true] %s213_s10 }
   0xe   : > { %p920_p6 = scmp.ge.s32.totalorder %s1357_s26, 2  ;;  %s239_s14 = sshll.u32 %s1628_s3, 4  ;;  %s240_s14 = int_to_ptr.hbm [resolvable:$true] %s239_s14 }
   0xf   : > { %p1006_p4 = pneg %p1448_p3  ;;  %s1360_s15 = smov 64  }
  0x10   : > { %s1361_s16 = smov 4   ;;  %s1362_s17 = smov [#allocation11]  }
  0x11   : > { %p1456_p5 = pnand %p1006_p4, %p1440_p1  ;;  %s241_s18 = sshll.u32 %s1362_s17, 4  ;;  %s242_s18 = int_to_ptr.vmem [resolvable:$true] %s241_s18 }
  0x12   : > { %s211_s7 = sshll.u32 %s1634_s1, 4  ;;  %s225_s29 = sshll.u32 %s1627_s2, 4  ;;  %s212_s7 = int_to_ptr.hbm [resolvable:$true] %s211_s7  ;;  %s226_s29 = int_to_ptr.hbm [resolvable:$true] %s225_s29 }
  0x13   : > { %1009 = dma.hbm_to_vmem [thread:$0]  (!%p1456_p5), %s212_s7, 256, %s214_s10, [#allocation9], %s1360_s15, %s1360_s15, %s1361_s16  }
  0x14   : > { %1015 = dma.hbm_to_vmem [thread:$0]  (!%p1456_p5), %s240_s14, 256, %s242_s18, [#allocation12], %s1360_s15, %s1360_s15, %s1361_s16  }
  0x15   : > { %s253_s7 = sshll.u32 %s1629_s4, 4  ;;  %s1363_s10 = smov [#allocation10]   ;;  %s254_s7 = int_to_ptr.hbm [resolvable:$true] %s253_s7 }
  0x16   : > { %s227_s12 = sshll.u32 %s1363_s10, 4  ;;  %s1364_s13 = smov [#allocation13]   ;;  %s228_s12 = int_to_ptr.vmem [resolvable:$true] %s227_s12 }
  0x17   : > { %1012 = dma.hbm_to_vmem [thread:$0]  (!%p1456_p5), %s226_s29, 256, %s228_s12, [#allocation9], %s1360_s15, %s1360_s15, %s1361_s16  }
  0x18   : > { %s255_s17 = sshll.u32 %s1364_s13, 4  ;;  %s36_s14 = sadd.s32 1, %s1353_s25  ;;  %s256_s17 = int_to_ptr.vmem [resolvable:$true] %s255_s17 }
  0x19   : > { %1018 = dma.hbm_to_vmem [thread:$0]  (!%p1456_p5), %s254_s7, 256, %s256_s17, [#allocation12], %s1360_s15, %s1360_s15, %s1361_s16  }
  0x1a   : > { %s914_s18 = sadd.s32 4294967294, %s1357_s26   ;;  %p38_p7 = scmp.ge.s32.totalorder %s36_s14, 2 }
  0x1b   : > { %s43_s19 = sadd.s32 1, %s1345_s23  ;;  %p50_p8 = scmp.ne.s32.totalorder %s1345_s23, %s1341_s22 }
  0x1c   : > { %s1646_s14 = smov (%p38_p7, %s36_s14), 0  ;;  %p51_p9 = scmp.eq.s32.totalorder %s1357_s26, 0 }
  0x1d   : > { %p56_p10 = scmp.ne.s32.totalorder %s1341_s22, %s1337_s21  ;;  %s40_s20 = ssub.s32 %s1353_s25, %s1646_s14 }
  0x1e   : > { %p187_p11 = scmp.eq.s32.totalorder %s913_s27, 1  ;;  %p41_p12 = scmp.eq.s32.totalorder %s40_s20, 0 }
  0x1f   : > { %p1494_p13 = por %p1440_p1, %p56_p10  ;;  %p193_p2 = scmp.eq.s32.totalorder %s914_s18, 1 }
  0x20   : > { %p1498_p0 = por %p187_p11, %p50_p8  ;;  %p52_p4 = por %p51_p9, %p50_p8 }
  0x21   : > { %s1503_s16 = scalar_select %p41_p12, %s1345_s23, %s43_s19  }
  0x22   : > { %p1505_p5 = por %p193_p2, %p56_p10  ;;  %s272_s30 = sand.u32 1, %s1345_s23  }
  0x23   : > { %s922_s27 = sshll.u32 %s1353_s25, 2  ;;  %p1031_p7 = scmp.lt.s32.totalorder %s1357_s26, 2 }
  0x24   : > { %s921_s9 = sshll.u32 %s272_s30, 2  ;;  %s280_s12 = scalar_lea.hbm %s1625_s0, %s922_s27 }
  0x25   : > { %s282_s13 = sshll.u32 %s280_s12, 4  ;;  %s276_s17 = scalar_lea.vmem [#allocation5], %s921_s9  ;;  %s283_s13 = int_to_ptr.hbm [resolvable:$true] %s282_s13 }
  0x26   : > { %s284_s20 = sshll.u32 %s276_s17, 4  ;;  %p1020_p11 = pnand %p1031_p7, %p52_p4  ;;  %s285_s20 = int_to_ptr.vmem [resolvable:$true] %s284_s20 }
  0x27   : > { %s273_s18 = scalar_lea.sflag [#allocation6], %s272_s30  ;;  %293 = sbr.rel (%p1448_p3) target bundleno = 1139 (0x473), region = 44 }
  0x28   : > { %1022 = dma.hbm_to_vmem [thread:$0]  (!%p1020_p11), %s283_s13, 64, %s285_s20, %s273_s18  }
  0x29   : > { %s1518_s19 = sand.u32 (!%p1448_p3), 1, %s1341_s22  }
  0x2a   : > { %s924_s1 = sshll.u32 (!%p1448_p3), %s1518_s19, 2  ;;  %s296_s7 = scalar_lea.sflag (!%p1448_p3), [#allocation6], %s1518_s19 }
  0x2b   : > { %s299_s27 = scalar_lea.vmem (!%p1448_p3), [#allocation5], %s924_s1 }
  0x2c   : > { %1320 = dma.done.wait (%p1494_p13), %s296_s7, 64  }
  0x2d   : > { %1322 = vsyncadd (%p1494_p13), %s296_s7, 4294967232 }
  0x2e   : > { %1324 = dma.done.wait (%p1440_p1), [#allocation9], 512  }
  0x2f   : > { %1326 = vsyncadd (%p1440_p1), [#allocation9], 4294966784 }
  0x30   : > { %1328 = dma.done.wait (%p1440_p1), [#allocation12], 512  }
  0x31   : > { %1330 = vsyncadd (%p1440_p1), [#allocation12], 4294966784  ;;  %v979_v0 = vld [vmem:[#allocation10 + $0x8] sm:$0xff]  ;;  %v983_v1 = vld [vmem:[#allocation8 + $0x8] sm:$0xff]  ;;  %vm373_vm0 = vcmask 261120   ;;  %vm422_vm1 = vcmask 257024  }
  0x32   : > { %v978_v2 = vld [vmem:[#allocation10] sm:$0xff]  ;;  %383 = vmatpush.bf16.msra.mxu0 %v979_v0  ;;  %460 = vmatpush.bf16.msra.mxu2 %v983_v1  ;;  %v982_v3 = vld [vmem:[#allocation8] sm:$0xff]  ;;  %v354_v4 = vld [vmem:[%s299_s27] sm:$0xf]  ;;  %vm469_vm2 = vcmask 64512   ;;  %s1365_s30 = smov 112  }
  0x33   : > { %v431_v5 = vld [vmem:[%s299_s27] sm:$0xf]  ;;  %v1097_v6 = vld [vmem:[%s1630_s5 + $0x1] ss:$0 sm:$0xff]  ;;  %v1098_v10 = vld [vmem:[%s1630_s5] ss:$0 sm:$0xff] }
  0x34   : > { %s1366_s9 = smov 120   ;;  %s1367_s10 = smov 104   ;;  %v981_v29 = vld [vmem:[#allocation11 + $0x8] sm:$0xff]  ;;  %v980_v30 = vld [vmem:[#allocation11] sm:$0xff]  ;;  %vm505_vm3 = vcmask 1043456   ;;  %vm523_vm4 = vcmask 60416  }
  0x35   : > { %414 = vmatpush.bf16.msra.mxu1 %v981_v29  ;;  %v1099_v43 = vld [vmem:[%s1630_s5 + $0x2] ss:$0 sm:$0xff]  ;;  %s1368_s17 = smov 8   ;;  %s1369_s20 = smov 24   ;;  %vm597_vm5 = vcmask 126016   ;;  %vm668_vm6 = vcmask 191616  }
  0x36   : > { %384 = vmatpush.bf16.msra.mxu0 %v978_v2  ;;  %461 = vmatpush.bf16.msra.mxu2 %v982_v3  ;;  %s1370_s18 = smov 16   ;;  %vm739_vm7 = vcmask 257216   ;;  %s975_s7 = sshll.u32 %s1349_s24, 3 }
  0x37   : > { %s929_s27 = sshll.u32 %s1518_s19, 3  ;;  %s789_s28 = scalar_lea.hbm %s1631_s6, %s975_s7 }
  0x38   : > { %s793_s12 = sshll.u32 %s789_s28, 4  ;;  %s778_s24 = scalar_lea.sflag [#allocation7], %s1518_s19  ;;  %s794_s12 = int_to_ptr.hbm [resolvable:$true] %s793_s12 }
  0x39   : > { %938 = vmatmul.msk.bf16.vlgmr.msra.gmra.mxu0 %vm373_vm0, %v354_v4  ;;  %956 = vmatmul.msk.bf16.vlgmr.msra.gmra.mxu2 %vm373_vm0, %v431_v5  ;;  %s1281_s13 = sshra.s32 %s794_s12, 4  ;;  %s1287_s7 = scalar_lea.hbm %s1631_s6, 16  ;;  %s1282_s13 = int_to_ptr.hbm [resolvable:$true] %s1281_s13 }
  0x3a   : > { %415 = vmatpush.bf16.msra.mxu1 %v980_v30  ;;  %p1288_p9 = scmp.lt.s32.totalorder %s1282_s13, %s1631_s6 }
  0x3d   : > { %947 = vmatmul.msk.bf16.vlgmr.msra.gmra.mxu1 %vm373_vm0, %v354_v4 }
  0xb6   : > { %v386_v7 = vpop.f32.mrf.mxu0 }
  0xb7   : > { %v387_v8 = vadd.f32 %v1097_v6, %v386_v7 }
  0xb9   : > { %v421_v9 = vpack.c.bf16 %v387_v8, %v387_v8 }
  0xba   : > { %v417_v44 = vpop.f32.mrf.mxu1 }
  0xbb   : > { %423 = vst.msk [vmem:[#allocation2] sm:$0xf] %vm422_vm1, %v421_v9  ;;  %v418_v45 = vadd.f32 %v1099_v43, %v417_v44 }
  0xbc   : > { %v463_v11 = vpop.f32.mrf.mxu2 }
  0xbd   : > { %v464_v12 = vadd.f32 %v1098_v10, %v463_v11  ;;  %v424_v46 = vpack.c.bf16 %v418_v45, %v418_v45 }
  0xbe   : > { %v388_v13 = vpop.f32.mrf.mxu0 }
  0xbf   : > { %v467_v14 = vpack.c.bf16 %v464_v12, %v464_v12  ;;  %425 = vst.msk [vmem:[#allocation3] sm:$0xf] %vm422_vm1, %v424_v46 }
  0xc1   : > { %v527_v15 = vunpack.c.l.b16 %v467_v14 }
  0xc2   : > { %v468_v16 = vld [vmem:[#allocation2] sm:$0xf]  ;;  %v419_v47 = vpop.f32.mrf.mxu1 }
  0xc3   : > { %v599_v17 = vld [vmem:[#allocation2] sm:$0xf]  ;;  %v528_v19 = vpack.c.b16 %v527_v15, %v527_v15  ;;  %v474_v20 = vsel %vm469_vm2, %v468_v16, 0 }
  0xc4   : > { %v525_v18 = vld [vmem:[#allocation2] sm:$0xf]  ;;  %v603_v21 = vunpack.c.l.b16 %v599_v17  ;;  %483 = vmatpush.bf16.xpose.msra.mxu3 %v474_v20  ;;  %v465_v23 = vpop.f32.mrf.mxu2 }
  0xc5   : > { %v532_v22 = vunpack.c.l.b16 %v525_v18  ;;  %600 = vrot.lane.b32.xlu2 %v528_v19, %s1365_s30  ;;  %v670_v26 = vld [vmem:[#allocation2] sm:$0xf] }
  0xc6   : > { %v604_v24 = vpack.c.b16 %v603_v21, %v603_v21  ;;  %v674_v27 = vunpack.c.l.b16 %v670_v26  ;;  %v501_v48 = vld [vmem:[#allocation3] sm:$0xf] }
  0xc7   : > { %v533_v25 = vpack.c.b16 %v532_v22, %v532_v22  ;;  %v507_v49 = vsel %vm505_vm3, %v501_v48, 0  ;;  %v567_v0 = vld [vmem:[#allocation3] sm:$0xf] }
  0xc8   : > { %605 = vrot.lane.b32.xlu1 %v604_v24, %s1365_s30  ;;  %v675_v28 = vpack.c.b16 %v674_v27, %v674_v27  ;;  %516 = vmatpush.bf16.msrb.mxu0 %v507_v49  ;;  %v569_v1 = vunpack.c.l.b16 %v567_v0  ;;  %v709_v24 = vld [vmem:[#allocation3] sm:$0xf]  ;;  %v1100_v0 = vld [vmem:[%s1630_s5 + $0x3] ss:$0 sm:$0xff] }
  0xc9   : > { %534 = vrot.lane.b32.xlu0 %v533_v25, %s1366_s9  ;;  %v711_v25 = vunpack.c.l.b16 %v709_v24  ;;  %v638_v27 = vld [vmem:[#allocation3] sm:$0xf] }
  0xca   : > { %v570_v2 = vpack.c.b16 %v569_v1, %v569_v1 }
  0xcb   : > { %957 = vmatmul.msk.bf16.vlgmr.msra.gmra.mxu3 %vm469_vm2, %v467_v14  ;;  %v712_v26 = vpack.c.b16 %v711_v25, %v711_v25 }
  0xcd   : > { %671 = vrot.lane.b32.xlu2 %v528_v19, %s1367_s10 }
  0xd0   : > { %676 = vrot.lane.b32.xlu1 %v675_v28, %s1367_s10  ;;  %v640_v28 = vunpack.c.l.b16 %v638_v27 }
  0xd1   : > { %529 = vrot.lane.b32.xlu0 %v528_v19, %s1366_s9 }
  0xd2   : > { %v641_v29 = vpack.c.b16 %v640_v28, %v640_v28 }
 0x11f   : > { %v601_v35 = vpop.permute.xlu2 %600 }
 0x127   : > { %v672_v41 = vpop.permute.xlu2 %671 }
 0x13a   : > { %v606_v31 = vpop.permute.xlu1 %605 }
 0x13b   : > { %v535_v32 = vpop.permute.xlu0 %534  ;;  %v611_v34 = vsel %vm469_vm2, %v606_v31, 0 }
 0x13c   : > { %v540_v33 = vsel %vm469_vm2, %v535_v32, 0  ;;  %620 = vmatpush.bf16.xpose.msrb.mxu3 %v611_v34 }
 0x13d   : > { %549 = vmatpush.bf16.xpose.msrb.mxu1 %v540_v33 }
 0x142   : > { %v677_v36 = vpop.permute.xlu1 %676 }
 0x143   : > { %v530_v37 = vpop.permute.xlu0 %529  ;;  %v682_v38 = vsel %vm469_vm2, %v677_v36, 0  ;;  %961 = vmatmul.msk.bf16.vlgmr.msrb.gmra.mxu3 %vm469_vm2, %v601_v35 }
 0x144   : > { %959 = vmatmul.msk.bf16.vlgmr.msrb.gmra.mxu1 %vm469_vm2, %v530_v37 }
 0x145   : > { %691 = vmatpush.bf16.xpose.msra.mxu1 %v682_v38 }
 0x14e   : > { %v485_v39 = vpop.f32.mrf.mxu3 }
 0x14f   : > { %v489_v40 = vsel %vm469_vm2, %v485_v39, -inf }
 0x150   : > { %490 = vmax.xlane.f32.xlu1 %v489_v40 }
 0x154   : > { %963 = vmatmul.msk.bf16.vlgmr.msra.gmra.mxu1 %vm469_vm2, %v672_v41 }
 0x156   : > { %v487_v42 = vpop.f32.mrf.mxu3 }
 0x1c1   : > { %v551_v50 = vpop.f32.mrf.mxu1 }
 0x1c2   : > { %v555_v51 = vsel %vm469_vm2, %v551_v50, -inf }
 0x1c3   : > { %556 = vmax.xlane.f32.xlu0 %v555_v51  ;;  %v491_v52 = vpop.xlane.xlu1 %490 }
 0x1c4   : > { %v492_v53 = vsub.f32 %v485_v39, %v491_v52 }
 0x1c6   : > { %v622_v54 = vpop.f32.mrf.mxu3  ;;  %v493_v55 = vmul.f32 1.442695, %v492_v53 }
 0x1c7   : > { %v626_v63 = vsel %vm469_vm2, %v622_v54, -inf }
 0x1c8   : > { %1101 = vpow2.f32 %v493_v55 }
 0x1c9   : > { %v553_v56 = vpop.f32.mrf.mxu1 }
 0x1ce   : > { %v624_v57 = vpop.f32.mrf.mxu3  ;;  %v1102_v58 = vpop.eup %1101 }
 0x1cf   : > { %v495_v60 = vsel %vm469_vm2, %v1102_v58, 0.0 }
 0x1d0   : > { %496 = vadd.xlane.f32.xlu1 %v495_v60  ;;  %v984_v60 = vld [vmem:[#allocation13] sm:$0xff] }
 0x1d1   : > { %v693_v59 = vpop.f32.mrf.mxu1 }
 0x1d2   : > { %v697_v61 = vsel %vm469_vm2, %v693_v59, -inf }
 0x1d3   : > { %698 = vmax.xlane.f32.xlu2 %v697_v61 }
 0x1d9   : > { %v695_v62 = vpop.f32.mrf.mxu1 }
 0x1db   : > { %627 = vmax.xlane.f32.xlu2 %v626_v63 }
 0x1f3   : > { %571 = vrot.lane.b32.xlu2 %v570_v2, %s1366_s9  ;;  %s348_s9 = scalar_lea.vmem [#allocation14], %s929_s27 }
 0x236   : > { %v557_v3 = vpop.xlane.xlu0 %556 }
 0x237   : > { %v558_v4 = vsub.f32 %v551_v50, %v557_v3 }
 0x239   : > { %v559_v5 = vmul.f32 1.442695, %v558_v4 }
 0x23b   : > { %1103 = vpow2.f32 %v559_v5 }
 0x241   : > { %v1104_v6 = vpop.eup %1103 }
 0x242   : > { %v561_v7 = vsel %vm469_vm2, %v1104_v6, 0.0 }
 0x243   : > { %562 = vadd.xlane.f32.xlu0 %v561_v7  ;;  %v497_v8 = vpop.xlane.xlu1 %496 }
 0x244   : > { %1105 = vrcp.f32 %v497_v8 }
 0x246   : > { %v699_v9 = vpop.xlane.xlu2 %698 }
 0x247   : > { %v700_v10 = vsub.f32 %v693_v59, %v699_v9  ;;  %v985_v59 = vld [vmem:[#allocation13 + $0x8] sm:$0xff] }
 0x248   : > { %769 = vmatpush.bf16.msra.mxu3 %v985_v59 }
 0x249   : > { %v701_v11 = vmul.f32 1.442695, %v700_v10 }
 0x24a   : > { %v1106_v12 = vpop.eup %1105 }
 0x24b   : > { %1107 = vpow2.f32 %v701_v11  ;;  %v499_v13 = vmul.f32 %v1106_v12, %v1102_v58 }
 0x24c   : > { %770 = vmatpush.bf16.msra.mxu3 %v984_v60 }
 0x24d   : > { %v500_v16 = vpack.c.bf16 %v499_v13, %v499_v13 }
 0x24e   : > { %v628_v14 = vpop.xlane.xlu2 %627 }
 0x24f   : > { %v629_v15 = vsub.f32 %v622_v54, %v628_v14  ;;  %958 = vmatmul.msk.bf16.vlgmr.msrb.gmra.mxu0 %vm469_vm2, %v500_v16 }
 0x251   : > { %v1108_v17 = vpop.eup %1107  ;;  %v630_v18 = vmul.f32 1.442695, %v629_v15 }
 0x252   : > { %v703_v19 = vsel %vm469_vm2, %v1108_v17, 0.0 }
 0x253   : > { %1109 = vpow2.f32 %v630_v18  ;;  %704 = vadd.xlane.f32.xlu0 %v703_v19 }
 0x256   : > { %v572_v20 = vpop.permute.xlu2 %571 }
 0x257   : > { %v577_v21 = vsel %vm505_vm3, %v572_v20, 0 }
 0x258   : > { %586 = vmatpush.bf16.msrb.mxu2 %v577_v21 }
 0x259   : > { %v1110_v22 = vpop.eup %1109 }
 0x25a   : > { %v632_v23 = vsel %vm469_vm2, %v1110_v22, 0.0 }
 0x25b   : > { %633 = vadd.xlane.f32.xlu1 %v632_v23 }
 0x267   : > { %713 = vrot.lane.b32.xlu0 %v712_v26, %s1367_s10  ;;  %s791_s10 = sshll.u32 %s348_s9, 4  ;;  %s792_s10 = int_to_ptr.vmem [resolvable:$true] %s791_s10 }
 0x274   : > { %642 = vrot.lane.b32.xlu1 %v641_v29, %s1365_s30 }
 0x2b6   : > { %v563_v30 = vpop.xlane.xlu0 %562 }
 0x2b7   : > { %1111 = vrcp.f32 %v563_v30 }
 0x2bd   : > { %v1112_v31 = vpop.eup %1111 }
 0x2be   : > { %v565_v32 = vmul.f32 %v1112_v31, %v1104_v6 }
 0x2c0   : > { %v566_v33 = vpack.c.bf16 %v565_v32, %v565_v32 }
 0x2c2   : > { %960 = vmatmul.msk.bf16.vlgmr.msrb.gmra.mxu2 %vm469_vm2, %v566_v33 }
 0x2c6   : > { %v705_v34 = vpop.xlane.xlu0 %704 }
 0x2c7   : > { %1113 = vrcp.f32 %v705_v34 }
 0x2cc   : > { %v518_v35 = vpop.f32.mrf.mxu0 }
 0x2cd   : > { %v522_v36 = vpack.c.bf16 %v518_v35, %v518_v35  ;;  %v1114_v37 = vpop.eup %1113 }
 0x2ce   : > { %v707_v39 = vmul.f32 %v1114_v37, %v1108_v17  ;;  %v634_v40 = vpop.xlane.xlu1 %633 }
 0x2cf   : > { %524 = vst.msk [vmem:[#allocation4] sm:$0xf] %vm523_vm4, %v522_v36  ;;  %1115 = vrcp.f32 %v634_v40 }
 0x2d0   : > { %v708_v43 = vpack.c.bf16 %v707_v39, %v707_v39 }
 0x2d4   : > { %v520_v38 = vpop.f32.mrf.mxu0 }
 0x2d5   : > { %v1116_v44 = vpop.eup %1115 }
 0x2d6   : > { %v636_v45 = vmul.f32 %v1116_v44, %v1110_v22 }
 0x2d8   : > { %v637_v48 = vpack.c.bf16 %v636_v45, %v636_v45 }
 0x2d9   : > { %v714_v41 = vpop.permute.xlu0 %713 }
 0x2da   : > { %v719_v42 = vsel %vm505_vm3, %v714_v41, 0 }
 0x2db   : > { %728 = vmatpush.bf16.msra.mxu2 %v719_v42 }
 0x2de   : > { %964 = vmatmul.msk.bf16.vlgmr.msra.gmra.mxu2 %vm469_vm2, %v708_v43 }
 0x2e6   : > { %v643_v46 = vpop.permute.xlu1 %642 }
 0x2e7   : > { %v648_v47 = vsel %vm505_vm3, %v643_v46, 0 }
 0x2e8   : > { %657 = vmatpush.bf16.msra.mxu0 %v648_v47 }
 0x2eb   : > { %962 = vmatmul.msk.bf16.vlgmr.msra.gmra.mxu0 %vm469_vm2, %v637_v48 }
 0x345   : > { %v588_v49 = vpop.f32.mrf.mxu2 }
 0x346   : > { %v592_v50 = vpack.c.bf16 %v588_v49, %v588_v49 }
 0x348   : > { %594 = vrot.lane.b32.xlu2 %v592_v50, %s1368_s17  ;;  %s1283_s17 = scalar_lea.hbm %s1282_s13, 8 }
 0x349   : > { %p1284_p1 = scmp.ne.s32.totalorder %s1282_s13, %s1283_s17  ;;  %p1289_p10 = scmp.lt.s32.totalorder %s1287_s7, %s1283_s17 }
 0x34b   : > { %p1285_p3 = pnand %p1284_p1, %p1498_p0  ;;  %p1290_p12 = por %p1289_p10, %p1288_p9 }
 0x34d   : > { %v590_v51 = vpop.f32.mrf.mxu2  ;;  %p1286_p8 = pneg %p1285_p3 }
 0x34f   : > { %p1291_p13 = pnand %p1290_p12, %p1286_p8 }
 0x361   : > { %v730_v52 = vpop.f32.mrf.mxu2 }
 0x362   : > { %v734_v53 = vpack.c.bf16 %v730_v52, %v730_v52 }
 0x364   : > { %736 = vrot.lane.b32.xlu2 %v734_v53, %s1369_s20 }
 0x368   : > { %v659_v54 = vpop.f32.mrf.mxu0 }
 0x369   : > { %v663_v55 = vpack.c.bf16 %v659_v54, %v659_v54  ;;  %v732_v56 = vpop.f32.mrf.mxu2 }
 0x36b   : > { %665 = vrot.lane.b32.xlu0 %v663_v55, %s1370_s18 }
 0x370   : > { %v661_v57 = vpop.f32.mrf.mxu0 }
 0x3a2   : > { %v595_v58 = vpop.permute.xlu2 %594 }
 0x3a3   : > { %598 = vst.msk [vmem:[#allocation4] sm:$0xf] %vm597_vm5, %v595_v58 }
 0x3be   : > { %v737_v62 = vpop.permute.xlu2 %736 }
 0x3dd   : > { %v666_v61 = vpop.permute.xlu0 %665 }
 0x3de   : > { %669 = vst.msk [vmem:[#allocation4] sm:$0xf] %vm668_vm6, %v666_v61 }
 0x3df   : > { %740 = vst.msk [vmem:[#allocation4] sm:$0xf] %vm739_vm7, %v737_v62 }
 0x3e6   : > { %v741_v63 = vld [vmem:[#allocation4] sm:$0xf] }
 0x3e7   : > { %973 = vmatmul.msk.bf16.vlgmr.msra.gmra.mxu3 %vm373_vm0, %v741_v63 }
 0x46a   : > { %v772_v1 = vpop.f32.mrf.mxu3 }
 0x46b   : > { %v773_v2 = vadd.f32 %v1100_v0, %v772_v1 }
 0x46d   : > { %776 = vst.msk [vmem:[%s348_s9] sm:$0xff] %vm373_vm0, %v773_v2 }
 0x46e   : > { %1294 = shalt.err (!%p1291_p13)
}
 0x46f   : > { %1004 = dma.vmem_to_hbm [thread:$0]  (%p1498_p0), %s792_s10, 128, %s794_s12, %s778_s24  }
 0x472   : > { %v774_v3 = vpop.f32.mrf.mxu3 }
 0x473 PF: > { %s805_s19 = sand.u32 1, %s1337_s21   ;;  %p1024_p2 = pnand %p920_p6, %p1505_p5 }
 0x474   : > { %s806_s8 = scalar_lea.sflag [#allocation7], %s805_s19 }
 0x475   : > { %p1025_p4 = pneg %p1024_p2 }
 0x477   : > { %1332 = dma.done.wait (%p1025_p4), %s806_s8, 128  }
 0x478   : > { %1334 = vsyncadd (%p1025_p4), %s806_s8, 4294967168  ;;  %s24_s26 = sadd.s32 1, %s1357_s26   ;;  %s1640_s21 = smov %s1341_s22 }
 0x479   : > { %p21_p7 = scmp.ge.s32.totalorder %s24_s26, 4   ;;  %s1641_s22 = smov %s1345_s23 }
 0x47a   : > { %s1642_s23 = smov %s1503_s16  ;;  %s1643_s24 = smov %s1353_s25 }
 0x47b   : > { %s1644_s25 = smov %s1646_s14  ;;  %23 = sbr.rel (!%p21_p7) target bundleno = 10 (0xa), region = 110 }
 0x480   :  { %812 = vsyncpa [#allocation6], 1 }
 0x481   :  { %814 = vsyncpa [#allocation6 + $0x1], 1 }
 0x482   :  { %815 = vsyncpa [#allocation9], 1 }
 0x483   :  { %816 = vsyncpa [#allocation12], 1 }
 0x484   :  { %817 = vsyncpa [#allocation7], 1 }
 0x485   :  { %819 = vsyncpa [#allocation7 + $0x1], 1 }

</bundles_post_ra>
